<compile_context>
chip_gen: v6e
topology: v6e:2x2x1
jax: 0.10.0
libtpu: 0.0.40
codegen_flags: <defaults>
</compile_context>

<pallas_src>
import jax
import jax.numpy as jnp
import numpy as np
from jax.experimental import pallas as pl
from jax.experimental.pallas import tpu as pltpu


def _round_up(x, m):
    return ((x + m - 1) // m) * m


# ---------------------------------------------------------------------------
# Kernel
# ---------------------------------------------------------------------------
def _decoder_kernel(xcat_ref, h_ref, enc_ref,
                    wfused_ref, bfused_ref, wenc_ref, vaq_ref, wctx_ref,
                    wout_ref, bout_ref,
                    out_ref, hnew_ref, attn_ref):
    """One decoder step. Grid axis 0 tiles the (padded) vocab dimension."""
    f32 = jnp.float32
    Bp, S, Hp = enc_ref.shape

    enc = enc_ref[...]                                    # (Bp, S, Hp)  bf16
    bf = enc.dtype
    h = h_ref[...]                                        # (Bp, Hp)     f32

    # -- One fused MXU pass: [emb | h | z] @ packed weights + packed biases.
    #    Output column blocks (each Hp wide): [ r | u | xn+zn | hn | hW ].
    fused = jnp.dot(xcat_ref[...], wfused_ref[...],
                    preferred_element_type=f32) + bfused_ref[0, :]   # (Bp, 5*Hp)
    pre_r = fused[:, 0 * Hp:1 * Hp]                       # xr + hr + zr + bx_r + bh_r
    pre_u = fused[:, 1 * Hp:2 * Hp]                       # xu + hu + zu + bx_u + bh_u
    pre_xn = fused[:, 2 * Hp:3 * Hp]                      # xn + zn + bx_n
    pre_hn = fused[:, 3 * Hp:4 * Hp]                      # hn + bh_n
    hb = fused[:, 4 * Hp:5 * Hp]                          # h @ Wa_h^T + ba

    # -- 'concat' attention. enc.reshape is a layout no-op (S sublane-aligned,
    #    Hp a multiple of 128).
    encW = jnp.dot(enc.reshape(Bp * S, Hp), wenc_ref[...],
                   preferred_element_type=f32).reshape(Bp, S, Hp)
    energy = jnp.tanh(encW + hb[:, None, :]).astype(bf)   # (Bp, S, Hp)

    # Scores and context on the MXU (batched, flash-attention style). The Q
    # rows of vaq are identical replicas of va, so every q row carries the
    # same scores; row 0 is used.
    scores = jnp.einsum('bqh,bsh->bqs', vaq_ref[...], energy,
                        preferred_element_type=f32)        # (Bp, Q, S)
    m = jnp.max(scores, axis=-1, keepdims=True)
    e = jnp.exp(scores - m)
    attn = e * pl.reciprocal(jnp.sum(e, axis=-1, keepdims=True), approx=True)
    attn_ref[...] = attn[:, 0:1, :]                        # (Bp, 1, S)

    ctx = jnp.einsum('bqs,bsh->bqh', attn.astype(bf), enc,
                     preferred_element_type=f32)[:, 0, :]  # (Bp, Hp)

    # -- Context contribution to the gates, then the GRU update (f32 math).
    gc = jnp.dot(ctx.astype(bf), wctx_ref[...],
                 preferred_element_type=f32)               # (Bp, 3*Hp) = [cr|cu|cn]
    r = jax.nn.sigmoid(pre_r + gc[:, 0 * Hp:1 * Hp])
    u = jax.nn.sigmoid(pre_u + gc[:, 1 * Hp:2 * Hp])
    n = jnp.tanh(pre_xn + r * pre_hn + gc[:, 2 * Hp:3 * Hp])
    h_new = (1.0 - u) * n + u * h                          # (Bp, Hp)
    hnew_ref[...] = h_new

    # -- rnn2out projection for this vocab tile.
    out_ref[...] = (jnp.dot(h_new.astype(bf), wout_ref[...],
                            preferred_element_type=f32) + bout_ref[0, :])


# ---------------------------------------------------------------------------
# Parameters
# ---------------------------------------------------------------------------
def init_params(key, embedding_dim, hidden_dim, vocab_size, latent_dim):
    """Deterministic synthetic parameters with PyTorch-equivalent shapes."""
    H, E, V, Z = hidden_dim, embedding_dim, vocab_size, latent_dim
    ks = jax.random.split(key, 11)
    u = lambda k, s: jax.random.uniform(k, s, jnp.float32, -0.1, 0.1)
    return {
        # Attn('concat', H): nn.Linear(2H, H) weight (H, 2H), bias (H,); v (H,)
        "wa": u(ks[0], (H, 2 * H)),
        "ba": u(ks[1], (H,)),
        "va": u(ks[2], (H,)),
        # CustomGRUCell: x2h(E->3H), h2h(H->3H), c2h(H->3H), z2h(Z->3H); torch (3H, in)
        "wx": u(ks[3], (3 * H, E)),
        "bx": u(ks[4], (3 * H,)),
        "wh": u(ks[5], (3 * H, H)),
        "bh": u(ks[6], (3 * H,)),
        "wc": u(ks[7], (3 * H, H)),
        "wz": u(ks[8], (3 * H, Z)),
        # rnn2out: nn.Linear(H, V)
        "w_out": u(ks[9], (V, H)),
        "b_out": u(ks[10], (V,)),
    }


def pack_params(params, embedding_dim, hidden_dim, vocab_size, latent_dim,
                batch_pad, hid_pad, voc_pad, q_rows=8):
    """One-time weight packing: transpose, gate-pad to 128 lanes, cast to bf16."""
    f32, bf16 = jnp.float32, jnp.bfloat16
    E, H, V, Z = embedding_dim, hidden_dim, vocab_size, latent_dim
    Hp, Vp, Bp = hid_pad, voc_pad, batch_pad

    pad_c = lambda w: jnp.pad(w.astype(f32), ((0, 0), (0, Hp - H)))   # (in,H)->(in,Hp)
    pad_v = lambda b: jnp.pad(b.astype(f32), (0, Hp - H))             # (H,)->(Hp,)
    zer = lambda rows: jnp.zeros((rows, Hp), f32)

    def gates_T(w):   # torch (3H, in) -> three (in, H) blocks (r, u, n)
        return w[0:H].T, w[H:2 * H].T, w[2 * H:3 * H].T

    wx_r, wx_u, wx_n = gates_T(params["wx"])
    wh_r, wh_u, wh_n = gates_T(params["wh"])
    wz_r, wz_u, wz_n = gates_T(params["wz"])
    wc_r, wc_u, wc_n = gates_T(params["wc"])
    bx_r, bx_u, bx_n = (params["bx"][i * H:(i + 1) * H] for i in range(3))
    bh_r, bh_u, bh_n = (params["bh"][i * H:(i + 1) * H] for i in range(3))
    wa_hT = params["wa"][:, :H].T          # (H, H):  h   @ wa_hT
    wa_eT = params["wa"][:, H:].T          # (H, H):  enc @ wa_eT

    # Fused weight: rows [emb(E) | h(Hp) | z(Z)], cols [r | u | xn+zn | hn | hW].
    row_e = jnp.concatenate([pad_c(wx_r), pad_c(wx_u), pad_c(wx_n),
                             zer(E), zer(E)], axis=1)
    row_h = jnp.concatenate([pad_c(wh_r), pad_c(wh_u), zer(H),
                             pad_c(wh_n), pad_c(wa_hT)], axis=1)
    row_h = jnp.pad(row_h, ((0, Hp - H), (0, 0)))
    row_z = jnp.concatenate([pad_c(wz_r), pad_c(wz_u), pad_c(wz_n),
                             zer(Z), zer(Z)], axis=1)
    w_fused = jnp.concatenate([row_e, row_h, row_z], axis=0).astype(bf16)   # (E+Hp+Z, 5Hp)
    b_fused = jnp.concatenate([pad_v(bx_r) + pad_v(bh_r),
                               pad_v(bx_u) + pad_v(bh_u),
                               pad_v(bx_n), pad_v(bh_n),
                               pad_v(params["ba"])]).reshape(1, 5 * Hp)     # f32

    w_enc = jnp.pad(wa_eT.astype(f32),
                    ((0, Hp - H), (0, Hp - H))).astype(bf16)                # (Hp, Hp)
    va_q = jnp.broadcast_to(pad_v(params["va"]).reshape(1, 1, Hp),
                            (Bp, q_rows, Hp)).astype(bf16)                  # (Bp, Q, Hp)
    w_ctx = jnp.concatenate([pad_c(wc_r), pad_c(wc_u), pad_c(wc_n)], axis=1)
    w_ctx = jnp.pad(w_ctx, ((0, Hp - H), (0, 0))).astype(bf16)              # (Hp, 3Hp)
    w_out = jnp.pad(params["w_out"].T.astype(f32),
                    ((0, Hp - H), (0, Vp - V))).astype(bf16)                # (Hp, Vp)
    b_out = jnp.pad(params["b_out"].astype(f32), (0, Vp - V)).reshape(1, Vp)

    return dict(w_fused=w_fused, b_fused=b_fused, w_enc=w_enc, va_q=va_q,
                w_ctx=w_ctx, w_out=w_out, b_out=b_out)


# ---------------------------------------------------------------------------
# Wrapper (pack once, jit the per-step forward)
# ---------------------------------------------------------------------------
def make_decoder_step(params, embedding_dim, hidden_dim, vocab_size, latent_dim,
                      batch_size, src_len, v_tile=512):
    f32, bf16 = jnp.float32, jnp.bfloat16
    E, H, V, Z = embedding_dim, hidden_dim, vocab_size, latent_dim
    B, S = batch_size, src_len
    Bp = _round_up(B, 8)            # sublane-dense batch
    Hp = _round_up(H, 128)          # lane-dense hidden
    Vp = _round_up(V, 128)          # lane-dense vocab
    TV = min(v_tile, Vp)            # vocab tile (multiple of 128)
    Vp = _round_up(Vp, TV)
    Kf = E + Hp + Z                 # fused-matmul contraction dim
    Q = 8                           # replicated va rows (no degenerate matmul dims)

    packed = pack_params(params, E, H, V, Z, Bp, Hp, Vp, q_rows=Q)

    grid_spec = pltpu.PrefetchScalarGridSpec(
        num_scalar_prefetch=0,
        grid=(Vp // TV,),
        in_specs=[
            pl.BlockSpec((Bp, Kf), lambda j: (0, 0)),           # xcat  (bf16)
            pl.BlockSpec((Bp, Hp), lambda j: (0, 0)),           # h     (f32)
            pl.BlockSpec((Bp, S, Hp), lambda j: (0, 0, 0)),     # enc   (bf16)
            pl.BlockSpec((Kf, 5 * Hp), lambda j: (0, 0)),       # w_fused
            pl.BlockSpec((1, 5 * Hp), lambda j: (0, 0)),        # b_fused
            pl.BlockSpec((Hp, Hp), lambda j: (0, 0)),           # w_enc
            pl.BlockSpec((Bp, Q, Hp), lambda j: (0, 0, 0)),     # va_q
            pl.BlockSpec((Hp, 3 * Hp), lambda j: (0, 0)),       # w_ctx
            pl.BlockSpec((Hp, TV), lambda j: (0, j)),           # w_out tile
            pl.BlockSpec((1, TV), lambda j: (0, j)),            # b_out tile
        ],
        out_specs=[
            pl.BlockSpec((Bp, TV), lambda j: (0, j)),           # logits tile
            pl.BlockSpec((Bp, Hp), lambda j: (0, 0)),           # new hidden
            pl.BlockSpec((Bp, 1, S), lambda j: (0, 0, 0)),      # attention weights
        ],
    )
    call = pl.pallas_call(
        _decoder_kernel,
        out_shape=(
            jax.ShapeDtypeStruct((Bp, Vp), f32),
            jax.ShapeDtypeStruct((Bp, Hp), f32),
            jax.ShapeDtypeStruct((Bp, 1, S), f32),
        ),
        grid_spec=grid_spec,
        compiler_params=pltpu.CompilerParams(
            dimension_semantics=("arbitrary",)),
    )

    @jax.jit
    def step(emb, hidden, encoder_outputs, z):
        # emb: (B, E); hidden: (L, B, H); encoder_outputs: (S, B, H); z: (B, Z)
        h_top = hidden[-1].astype(f32)
        h_pad = jnp.pad(h_top, ((0, Bp - B), (0, Hp - H)))                     # (Bp, Hp)
        emb_p = jnp.pad(emb.astype(f32), ((0, Bp - B), (0, 0)))                # (Bp, E)
        z_p = jnp.pad(z.astype(f32), ((0, Bp - B), (0, 0)))                    # (Bp, Z)
        xcat = jnp.concatenate([emb_p, h_pad, z_p], axis=-1).astype(bf16)      # (Bp, Kf)
        enc = jnp.transpose(encoder_outputs, (1, 0, 2)).astype(f32)            # (B, S, H)
        enc_p = jnp.pad(enc, ((0, Bp - B), (0, 0), (0, Hp - H))).astype(bf16)  # (Bp, S, Hp)

        logits_p, hnew_p, attn_p = call(
            xcat, h_pad, enc_p,
            packed["w_fused"], packed["b_fused"], packed["w_enc"],
            packed["va_q"], packed["w_ctx"], packed["w_out"], packed["b_out"])

        out = logits_p[:B, :V]
        h_new = hnew_p[:B, :H].astype(hidden.dtype)
        new_hidden = hidden.at[-1].set(h_new)            # n_layers == 1
        attn_weights = attn_p[:B]                        # (B, 1, S)
        return out, new_hidden, attn_weights

    return step


# ---------------------------------------------------------------------------
# Pure-JAX reference (for correctness check)
# ---------------------------------------------------------------------------
def _reference_forward(params, emb, hidden, encoder_outputs, z):
    H = hidden.shape[-1]
    h = hidden[-1]
    enc = jnp.transpose(encoder_outputs, (1, 0, 2))                     # (B, S, H)
    wa_h, wa_e = params["wa"][:, :H], params["wa"][:, H:]
    energy = jnp.tanh((h @ wa_h.T)[:, None, :]
                      + jnp.einsum("bsh,gh->bsg", enc, wa_e)
                      + params["ba"][None, None, :])
    scores = jnp.einsum("bsh,h->bs", energy, params["va"])
    attn = jax.nn.softmax(scores, axis=-1)
    ctx = jnp.einsum("bs,bsh->bh", attn, enc)
    gx = emb @ params["wx"].T + params["bx"]
    gh = h @ params["wh"].T + params["bh"]
    gc = ctx @ params["wc"].T
    gz = z @ params["wz"].T
    sp = lambda g: (g[:, :H], g[:, H:2 * H], g[:, 2 * H:])
    (xr, xu, xn), (hr, hu, hn), (cr, cu, cn), (zr, zu, zn) = sp(gx), sp(gh), sp(gc), sp(gz)
    r = jax.nn.sigmoid(xr + hr + cr + zr)
    u = jax.nn.sigmoid(xu + hu + cu + zu)
    n = jnp.tanh(xn + r * hn + cn + zn)
    h_new = (1.0 - u) * n + u * h
    out = h_new @ params["w_out"].T + params["b_out"]
    return out, hidden.at[-1].set(h_new), attn[:, None, :]


if __name__ == "__main__":
    B, S, E, H, V, Z, L = 2, 8, 32, 32, 64, 16, 1

    key = jax.random.PRNGKey(0)
    kp, ke, kh, kenc, kz = jax.random.split(key, 5)

    params = init_params(kp, E, H, V, Z)
    emb = jax.random.normal(ke, (B, E), jnp.float32)
    hidden = jax.random.normal(kh, (L, B, H), jnp.float32)
    encoder_outputs = jax.random.normal(kenc, (S, B, H), jnp.float32)
    z = jax.random.normal(kz, (B, Z), jnp.float32)

    step = make_decoder_step(params, E, H, V, Z, batch_size=B, src_len=S)
    out, new_hidden, attn_weights = step(emb, hidden, encoder_outputs, z)
    jax.block_until_ready((out, new_hidden, attn_weights))

    # Correctness vs an f32 reference. Tolerance reflects bf16 MXU operands and
    # the approximate softmax reciprocal (expected error ~1e-3).
    r_out, r_hidden, r_attn = _reference_forward(params, emb, hidden, encoder_outputs, z)
    np.testing.assert_allclose(np.asarray(out), np.asarray(r_out), rtol=1e-2, atol=1e-2)
    np.testing.assert_allclose(np.asarray(new_hidden), np.asarray(r_hidden), rtol=1e-2, atol=1e-2)
    np.testing.assert_allclose(np.asarray(attn_weights), np.asarray(r_attn), rtol=1e-2, atol=1e-2)

    assert out.shape == (B, V) and new_hidden.shape == (L, B, H) and attn_weights.shape == (B, 1, S)
    print("KERNEL_OK")
</pallas_src>

<mosaic_0001>
module attributes {stable_mosaic.version = 11 : i64} {
  func.func @_decoder_kernel(%arg0: i32, %arg1: memref<8x176xbf16, #tpu.memory_space<vmem>>, %arg2: memref<8x128xf32, #tpu.memory_space<vmem>>, %arg3: memref<8x8x128xbf16, #tpu.memory_space<vmem>>, %arg4: memref<176x640xbf16, #tpu.memory_space<vmem>>, %arg5: memref<1x640xf32, #tpu.memory_space<vmem>>, %arg6: memref<128x128xbf16, #tpu.memory_space<vmem>>, %arg7: memref<8x8x128xbf16, #tpu.memory_space<vmem>>, %arg8: memref<128x384xbf16, #tpu.memory_space<vmem>>, %arg9: memref<128x128xbf16, #tpu.memory_space<vmem>>, %arg10: memref<1x128xf32, #tpu.memory_space<vmem>>, %arg11: memref<8x128xf32, #tpu.memory_space<vmem>>, %arg12: memref<8x128xf32, #tpu.memory_space<vmem>>, %arg13: memref<8x1x8xf32, #tpu.memory_space<vmem>>) attributes {dimension_semantics = [#tpu.dimension_semantics<arbitrary>], iteration_bounds = array<i64: 1>, scalar_prefetch = 0 : i64, scratch_operands = 0 : i64, tpu.core_type = #tpu.core_type<tc>, window_params = [{pipeline_mode = #tpu.pipeline_mode<synchronous>, transform_indices = @transform_0, window_bounds = array<i64: 8, 176>}, {pipeline_mode = #tpu.pipeline_mode<synchronous>, transform_indices = @transform_1, window_bounds = array<i64: 8, 128>}, {pipeline_mode = #tpu.pipeline_mode<synchronous>, transform_indices = @transform_2, window_bounds = array<i64: 8, 8, 128>}, {pipeline_mode = #tpu.pipeline_mode<synchronous>, transform_indices = @transform_3, window_bounds = array<i64: 176, 640>}, {pipeline_mode = #tpu.pipeline_mode<synchronous>, transform_indices = @transform_4, window_bounds = array<i64: 1, 640>}, {pipeline_mode = #tpu.pipeline_mode<synchronous>, transform_indices = @transform_5, window_bounds = array<i64: 128, 128>}, {pipeline_mode = #tpu.pipeline_mode<synchronous>, transform_indices = @transform_6, window_bounds = array<i64: 8, 8, 128>}, {pipeline_mode = #tpu.pipeline_mode<synchronous>, transform_indices = @transform_7, window_bounds = array<i64: 128, 384>}, {transform_indices = @transform_8, window_bounds = array<i64: 128, 128>}, {transform_indices = @transform_9, window_bounds = array<i64: 1, 128>}, {transform_indices = @transform_10, window_bounds = array<i64: 8, 128>}, {pipeline_mode = #tpu.pipeline_mode<synchronous>, transform_indices = @transform_11, window_bounds = array<i64: 8, 128>}, {pipeline_mode = #tpu.pipeline_mode<synchronous>, transform_indices = @transform_12, window_bounds = array<i64: 8, 1, 8>}]} {
    %c0 = arith.constant 0 : index
    %c0_0 = arith.constant 0 : index
    %c0_1 = arith.constant 0 : index
    %0 = vector.load %arg3[%c0, %c0_0, %c0_1] : memref<8x8x128xbf16, #tpu.memory_space<vmem>>, vector<8x8x128xbf16>
    %c0_2 = arith.constant 0 : index
    %c0_3 = arith.constant 0 : index
    %1 = vector.load %arg2[%c0_2, %c0_3] : memref<8x128xf32, #tpu.memory_space<vmem>>, vector<8x128xf32>
    %c0_4 = arith.constant 0 : index
    %c0_5 = arith.constant 0 : index
    %2 = vector.load %arg1[%c0_4, %c0_5] : memref<8x176xbf16, #tpu.memory_space<vmem>>, vector<8x176xbf16>
    %c0_6 = arith.constant 0 : index
    %c0_7 = arith.constant 0 : index
    %3 = vector.load %arg4[%c0_6, %c0_7] : memref<176x640xbf16, #tpu.memory_space<vmem>>, vector<176x640xbf16>
    %cst = arith.constant dense<0.000000e+00> : vector<8x640xf32>
    %4 = tpu.matmul %2, %3, %cst {dimension_numbers = #tpu.dot_dimension_numbers<[1], [0], [0], [1], [0, 0, 1, 1], [], []>} : vector<8x176xbf16>, vector<176x640xbf16>, vector<8x640xf32> -> vector<8x640xf32>
    %c0_8 = arith.constant 0 : index
    %c0_9 = arith.constant 0 : index
    %5 = vector.load %arg5[%c0_8, %c0_9] : memref<1x640xf32, #tpu.memory_space<vmem>>, vector<1x640xf32>
    %6 = vector.shape_cast %5 : vector<1x640xf32> to vector<640xf32>
    %7 = vector.shape_cast %6 : vector<640xf32> to vector<1x640xf32>
    %8 = vector.broadcast %7 : vector<1x640xf32> to vector<8x640xf32>
    %9 = arith.addf %4, %8 : vector<8x640xf32>
    %10 = vector.extract_strided_slice %9 {offsets = [0, 0], sizes = [8, 128], strides = [1, 1]} : vector<8x640xf32> to vector<8x128xf32>
    %11 = vector.extract_strided_slice %9 {offsets = [0, 128], sizes = [8, 128], strides = [1, 1]} : vector<8x640xf32> to vector<8x128xf32>
    %12 = vector.extract_strided_slice %9 {offsets = [0, 256], sizes = [8, 128], strides = [1, 1]} : vector<8x640xf32> to vector<8x128xf32>
    %13 = vector.extract_strided_slice %9 {offsets = [0, 384], sizes = [8, 128], strides = [1, 1]} : vector<8x640xf32> to vector<8x128xf32>
    %14 = vector.extract_strided_slice %9 {offsets = [0, 512], sizes = [8, 128], strides = [1, 1]} : vector<8x640xf32> to vector<8x128xf32>
    %15 = vector.shape_cast %0 : vector<8x8x128xbf16> to vector<64x128xbf16>
    %c0_10 = arith.constant 0 : index
    %c0_11 = arith.constant 0 : index
    %16 = vector.load %arg6[%c0_10, %c0_11] : memref<128x128xbf16, #tpu.memory_space<vmem>>, vector<128x128xbf16>
    %cst_12 = arith.constant dense<0.000000e+00> : vector<64x128xf32>
    %17 = tpu.matmul %15, %16, %cst_12 {dimension_numbers = #tpu.dot_dimension_numbers<[1], [0], [0], [1], [0, 0, 1, 1], [], []>} : vector<64x128xbf16>, vector<128x128xbf16>, vector<64x128xf32> -> vector<64x128xf32>
    %18 = vector.shape_cast %17 : vector<64x128xf32> to vector<8x8x128xf32>
    %19 = vector.shape_cast %14 : vector<8x128xf32> to vector<8x1x128xf32>
    %20 = vector.broadcast %19 : vector<8x1x128xf32> to vector<8x8x128xf32>
    %21 = arith.addf %18, %20 : vector<8x8x128xf32>
    %22 = math.tanh %21 : vector<8x8x128xf32>
    %23 = arith.truncf %22 : vector<8x8x128xf32> to vector<8x8x128xbf16>
    %c0_13 = arith.constant 0 : index
    %c0_14 = arith.constant 0 : index
    %c0_15 = arith.constant 0 : index
    %24 = vector.load %arg7[%c0_13, %c0_14, %c0_15] : memref<8x8x128xbf16, #tpu.memory_space<vmem>>, vector<8x8x128xbf16>
    "tpu.trace_start"() <{level = 10 : i32, message = "bqh,bsh->bqs"}> : () -> ()
    %cst_16 = arith.constant dense<0.000000e+00> : vector<8x8x8xf32>
    %25 = tpu.matmul %24, %23, %cst_16 {dimension_numbers = #tpu.dot_dimension_numbers<[2], [2], [1], [1], [0, 0, 0, 1, 1, 1], [0], [0]>} : vector<8x8x128xbf16>, vector<8x8x128xbf16>, vector<8x8x8xf32> -> vector<8x8x8xf32>
    "tpu.trace_stop"() : () -> ()
    %cst_17 = arith.constant dense<0xFF800000> : vector<8x8xf32>
    %26 = vector.multi_reduction <maximumf>, %25, %cst_17 [2] : vector<8x8x8xf32> to vector<8x8xf32>
    %27 = vector.shape_cast %26 : vector<8x8xf32> to vector<8x8x1xf32>
    %28 = vector.broadcast %27 : vector<8x8x1xf32> to vector<8x8x8xf32>
    %29 = arith.subf %25, %28 : vector<8x8x8xf32>
    %30 = math.exp %29 : vector<8x8x8xf32>
    %cst_18 = arith.constant dense<0.000000e+00> : vector<8x8xf32>
    %31 = vector.multi_reduction <add>, %30, %cst_18 [2] : vector<8x8x8xf32> to vector<8x8xf32>
    %32 = vector.shape_cast %31 : vector<8x8xf32> to vector<8x8x1xf32>
    %33 = tpu.reciprocal %32 {approx = true} : vector<8x8x1xf32> -> vector<8x8x1xf32>
    %34 = vector.broadcast %33 : vector<8x8x1xf32> to vector<8x8x8xf32>
    %35 = arith.mulf %30, %34 : vector<8x8x8xf32>
    %36 = vector.extract_strided_slice %35 {offsets = [0, 0, 0], sizes = [8, 1, 8], strides = [1, 1, 1]} : vector<8x8x8xf32> to vector<8x1x8xf32>
    %c0_19 = arith.constant 0 : index
    %c0_20 = arith.constant 0 : index
    %c0_21 = arith.constant 0 : index
    %37 = vector.load %arg13[%c0_19, %c0_20, %c0_21] : memref<8x1x8xf32, #tpu.memory_space<vmem>>, vector<8x1x8xf32>
    tpu.vector_store %arg13[%c0_19, %c0_20, %c0_21], %36 {strides = array<i32>} : memref<8x1x8xf32, #tpu.memory_space<vmem>>, vector<8x1x8xf32>,
    %38 = arith.truncf %35 : vector<8x8x8xf32> to vector<8x8x8xbf16>
    "tpu.trace_start"() <{level = 10 : i32, message = "bqs,bsh->bqh"}> : () -> ()
    %cst_22 = arith.constant dense<0.000000e+00> : vector<8x8x128xf32>
    %39 = tpu.matmul %38, %0, %cst_22 {dimension_numbers = #tpu.dot_dimension_numbers<[2], [1], [1], [2], [0, 0, 0, 1, 1, 2], [0], [0]>} : vector<8x8x8xbf16>, vector<8x8x128xbf16>, vector<8x8x128xf32> -> vector<8x8x128xf32>
    "tpu.trace_stop"() : () -> ()
    %40 = vector.extract_strided_slice %39 {offsets = [0, 0, 0], sizes = [8, 1, 128], strides = [1, 1, 1]} : vector<8x8x128xf32> to vector<8x1x128xf32>
    %41 = vector.shape_cast %40 : vector<8x1x128xf32> to vector<8x128xf32>
    %42 = arith.truncf %41 : vector<8x128xf32> to vector<8x128xbf16>
    %c0_23 = arith.constant 0 : index
    %c0_24 = arith.constant 0 : index
    %43 = vector.load %arg8[%c0_23, %c0_24] : memref<128x384xbf16, #tpu.memory_space<vmem>>, vector<128x384xbf16>
    %cst_25 = arith.constant dense<0.000000e+00> : vector<8x384xf32>
    %44 = tpu.matmul %42, %43, %cst_25 {dimension_numbers = #tpu.dot_dimension_numbers<[1], [0], [0], [1], [0, 0, 1, 1], [], []>} : vector<8x128xbf16>, vector<128x384xbf16>, vector<8x384xf32> -> vector<8x384xf32>
    %45 = vector.extract_strided_slice %44 {offsets = [0, 0], sizes = [8, 128], strides = [1, 1]} : vector<8x384xf32> to vector<8x128xf32>
    %46 = arith.addf %10, %45 : vector<8x128xf32>
    %47 = arith.negf %46 : vector<8x128xf32>
    %48 = math.exp %47 : vector<8x128xf32>
    %cst_26 = arith.constant 1.000000e+00 : f32
    %49 = vector.broadcast %cst_26 : f32 to vector<8x128xf32>
    %50 = arith.addf %49, %48 : vector<8x128xf32>
    %51 = arith.divf %49, %50 : vector<8x128xf32>
    %52 = vector.extract_strided_slice %44 {offsets = [0, 128], sizes = [8, 128], strides = [1, 1]} : vector<8x384xf32> to vector<8x128xf32>
    %53 = arith.addf %11, %52 : vector<8x128xf32>
    %54 = arith.negf %53 : vector<8x128xf32>
    %55 = math.exp %54 : vector<8x128xf32>
    %cst_27 = arith.constant 1.000000e+00 : f32
    %56 = vector.broadcast %cst_27 : f32 to vector<8x128xf32>
    %57 = arith.addf %56, %55 : vector<8x128xf32>
    %58 = arith.divf %56, %57 : vector<8x128xf32>
    %59 = arith.mulf %51, %13 : vector<8x128xf32>
    %60 = arith.addf %12, %59 : vector<8x128xf32>
    %61 = vector.extract_strided_slice %44 {offsets = [0, 256], sizes = [8, 128], strides = [1, 1]} : vector<8x384xf32> to vector<8x128xf32>
    %62 = arith.addf %60, %61 : vector<8x128xf32>
    %63 = math.tanh %62 : vector<8x128xf32>
    %cst_28 = arith.constant 1.000000e+00 : f32
    %64 = vector.broadcast %cst_28 : f32 to vector<8x128xf32>
    %65 = arith.subf %64, %58 : vector<8x128xf32>
    %66 = arith.mulf %65, %63 : vector<8x128xf32>
    %67 = arith.mulf %58, %1 : vector<8x128xf32>
    %68 = arith.addf %66, %67 : vector<8x128xf32>
    %c0_29 = arith.constant 0 : index
    %c0_30 = arith.constant 0 : index
    %69 = vector.load %arg12[%c0_29, %c0_30] : memref<8x128xf32, #tpu.memory_space<vmem>>, vector<8x128xf32>
    tpu.vector_store %arg12[%c0_29, %c0_30], %68 {strides = array<i32>} : memref<8x128xf32, #tpu.memory_space<vmem>>, vector<8x128xf32>,
    %70 = arith.truncf %68 : vector<8x128xf32> to vector<8x128xbf16>
    %c0_31 = arith.constant 0 : index
    %c0_32 = arith.constant 0 : index
    %71 = vector.load %arg9[%c0_31, %c0_32] : memref<128x128xbf16, #tpu.memory_space<vmem>>, vector<128x128xbf16>
    %cst_33 = arith.constant dense<0.000000e+00> : vector<8x128xf32>
    %72 = tpu.matmul %70, %71, %cst_33 {dimension_numbers = #tpu.dot_dimension_numbers<[1], [0], [0], [1], [0, 0, 1, 1], [], []>} : vector<8x128xbf16>, vector<128x128xbf16>, vector<8x128xf32> -> vector<8x128xf32>
    %c0_34 = arith.constant 0 : index
    %c0_35 = arith.constant 0 : index
    %73 = vector.load %arg10[%c0_34, %c0_35] : memref<1x128xf32, #tpu.memory_space<vmem>>, vector<1x128xf32>
    %74 = vector.shape_cast %73 : vector<1x128xf32> to vector<128xf32>
    %75 = vector.shape_cast %74 : vector<128xf32> to vector<1x128xf32>
    %76 = vector.broadcast %75 : vector<1x128xf32> to vector<8x128xf32>
    %77 = arith.addf %72, %76 : vector<8x128xf32>
    %c0_36 = arith.constant 0 : index
    %c0_37 = arith.constant 0 : index
    %78 = vector.load %arg11[%c0_36, %c0_37] : memref<8x128xf32, #tpu.memory_space<vmem>>, vector<8x128xf32>
    tpu.vector_store %arg11[%c0_36, %c0_37], %77 {strides = array<i32>} : memref<8x128xf32, #tpu.memory_space<vmem>>, vector<8x128xf32>,
    return
  }
  func.func @transform_0(%arg0: i32) -> (i32, i32) {
    %c0_i32 = arith.constant 0 : i32
    %c0_i32_0 = arith.constant 0 : i32
    %c0_i32_1 = arith.constant 0 : i32
    return %c0_i32, %c0_i32_0 : i32, i32
  }
  func.func @transform_1(%arg0: i32) -> (i32, i32) {
    %c0_i32 = arith.constant 0 : i32
    %c0_i32_0 = arith.constant 0 : i32
    %c0_i32_1 = arith.constant 0 : i32
    return %c0_i32, %c0_i32_0 : i32, i32
  }
  func.func @transform_2(%arg0: i32) -> (i32, i32, i32) {
    %c0_i32 = arith.constant 0 : i32
    %c0_i32_0 = arith.constant 0 : i32
    %c0_i32_1 = arith.constant 0 : i32
    %c0_i32_2 = arith.constant 0 : i32
    return %c0_i32, %c0_i32_0, %c0_i32_1 : i32, i32, i32
  }
  func.func @transform_3(%arg0: i32) -> (i32, i32) {
    %c0_i32 = arith.constant 0 : i32
    %c0_i32_0 = arith.constant 0 : i32
    %c0_i32_1 = arith.constant 0 : i32
    return %c0_i32, %c0_i32_0 : i32, i32
  }
  func.func @transform_4(%arg0: i32) -> (i32, i32) {
    %c0_i32 = arith.constant 0 : i32
    %c0_i32_0 = arith.constant 0 : i32
    %c0_i32_1 = arith.constant 0 : i32
    return %c0_i32, %c0_i32_0 : i32, i32
  }
  func.func @transform_5(%arg0: i32) -> (i32, i32) {
    %c0_i32 = arith.constant 0 : i32
    %c0_i32_0 = arith.constant 0 : i32
    %c0_i32_1 = arith.constant 0 : i32
    return %c0_i32, %c0_i32_0 : i32, i32
  }
  func.func @transform_6(%arg0: i32) -> (i32, i32, i32) {
    %c0_i32 = arith.constant 0 : i32
    %c0_i32_0 = arith.constant 0 : i32
    %c0_i32_1 = arith.constant 0 : i32
    %c0_i32_2 = arith.constant 0 : i32
    return %c0_i32, %c0_i32_0, %c0_i32_1 : i32, i32, i32
  }
  func.func @transform_7(%arg0: i32) -> (i32, i32) {
    %c0_i32 = arith.constant 0 : i32
    %c0_i32_0 = arith.constant 0 : i32
    %c0_i32_1 = arith.constant 0 : i32
    return %c0_i32, %c0_i32_0 : i32, i32
  }
  func.func @transform_8(%arg0: i32) -> (i32, i32) {
    %c0_i32 = arith.constant 0 : i32
    %c0_i32_0 = arith.constant 0 : i32
    return %c0_i32, %arg0 : i32, i32
  }
  func.func @transform_9(%arg0: i32) -> (i32, i32) {
    %c0_i32 = arith.constant 0 : i32
    %c0_i32_0 = arith.constant 0 : i32
    return %c0_i32, %arg0 : i32, i32
  }
  func.func @transform_10(%arg0: i32) -> (i32, i32) {
    %c0_i32 = arith.constant 0 : i32
    %c0_i32_0 = arith.constant 0 : i32
    return %c0_i32, %arg0 : i32, i32
  }
  func.func @transform_11(%arg0: i32) -> (i32, i32) {
    %c0_i32 = arith.constant 0 : i32
    %c0_i32_0 = arith.constant 0 : i32
    %c0_i32_1 = arith.constant 0 : i32
    return %c0_i32, %c0_i32_0 : i32, i32
  }
  func.func @transform_12(%arg0: i32) -> (i32, i32, i32) {
    %c0_i32 = arith.constant 0 : i32
    %c0_i32_0 = arith.constant 0 : i32
    %c0_i32_1 = arith.constant 0 : i32
    %c0_i32_2 = arith.constant 0 : i32
    return %c0_i32, %c0_i32_0, %c0_i32_1 : i32, i32, i32
  }
}

</mosaic_0001>

<bundles_post_ra>
// kernel: step.1
= control target key start
LH: loop header
LB: loop body
LE: loop exit
PB: predicated region body
PF: predicated region fallthrough
CT: control target
= control target key end

     0   :  { %18 = vsyncpa [#allocation3], 0  ;;  %s3135_s0 = inlined_call_operand.vmem [shape: bf16[8,176], index: 0, kind: input, shape index: {}]   ;;  %s3136_s1 = inlined_call_operand.vmem [shape: f32[8,128], index: 1, kind: input, shape index: {}]   ;;  %s3137_s2 = inlined_call_operand.vmem [shape: bf16[8,8,128], index: 2, kind: input, shape index: {}]   ;;  %s3138_s3 = inlined_call_operand.hbm [shape: bf16[176,640], index: 3, kind: input, shape index: {}]   ;;  %s3139_s4 = inlined_call_operand.vmem [shape: f32[1,640], index: 4, kind: input, shape index: {}]   ;;  %s3140_s5 = inlined_call_operand.hbm [shape: bf16[128,128], index: 5, kind: input, shape index: {}]   ;;  %s3141_s6 = inlined_call_operand.vmem [shape: bf16[8,8,128], index: 6, kind: input, shape index: {}]   ;;  %s3142_s7 = inlined_call_operand.hbm [shape: bf16[128,384], index: 7, kind: input, shape index: {}]   ;;  %s3143_s8 = inlined_call_operand.vmem [shape: bf16[128,128], index: 8, kind: input, shape index: {}]   ;;  %s3144_s9 = inlined_call_operand.vmem [shape: f32[1,128], index: 9, kind: input, shape index: {}]   ;;  %s3145_s10 = inlined_call_operand.vmem [shape: f32[8,128], index: 10, kind: output, shape index: {0}]   ;;  %s3146_s11 = inlined_call_operand.vmem [shape: f32[8,128], index: 11, kind: output, shape index: {1}]   ;;  %s3147_s12 = inlined_call_operand.vmem [shape: f32[8,1,8], index: 12, kind: output, shape index: {2}]  }
   0x1   :  { %19 = vsyncpa [#allocation5], 0  ;;  %s2712_s21 = smov [#allocation4]  }
   0x2   :  { %s45_s22 = sshll.u32 %s2712_s21, 4  ;;  %s46_s22 = int_to_ptr.vmem [resolvable:$true] %s45_s22 }
   0x3   :  { %s2656_s23 = scalar_lea.vmem %s46_s22, 1024  ;;  %p2661_p1 = scmp.lt.s32.totalorder %s46_s22, %s46_s22 }
   0x4   :  { %p2657_p0 = scmp.ne.s32.totalorder %s46_s22, %s2656_s23  ;;  %p2662_p2 = scmp.lt.s32.totalorder %s2656_s23, %s2656_s23 }
   0x6   :  { %p2663_p3 = por %p2662_p2, %p2661_p1 }
   0x8   :  { %p2664_p4 = pnand %p2663_p3, %p2657_p0 }
   0xa   :  { %2667 = shalt.err (!%p2664_p4)
}
   0xb   :  { %s2713_s24 = smov 64   ;;  %s2714_s25 = smov 4  }
   0xc   :  { %51 = dma.hbm_to_vmem [thread:$0]  %s3140_s5, 1024, %s46_s22, [#allocation5], %s2713_s24, %s2713_s24, %s2714_s25  }
   0xd   :  { %s2715_s28 = smov [#allocation2]  }
   0xe   :  { %s31_s29 = sshll.u32 %s2715_s28, 4  ;;  %s32_s29 = int_to_ptr.vmem [resolvable:$true] %s31_s29 }
   0xf   :  { %s2676_s30 = scalar_lea.vmem %s32_s29, 7040  ;;  %p2681_p6 = scmp.lt.s32.totalorder %s32_s29, %s32_s29 }
  0x10   :  { %p2677_p5 = scmp.ne.s32.totalorder %s32_s29, %s2676_s30  ;;  %p2682_p7 = scmp.lt.s32.totalorder %s2676_s30, %s2676_s30 }
  0x12   :  { %p2683_p8 = por %p2682_p7, %p2681_p6 }
  0x14   :  { %p2684_p9 = pnand %p2683_p8, %p2677_p5 }
  0x16   :  { %2687 = shalt.err (!%p2684_p9)
}
  0x17   :  { %s2716_s13 = smov 320   ;;  %s2717_s14 = smov 20  }
  0x18   :  { %37 = dma.hbm_to_vmem [thread:$0]  %s3138_s3, 7040, %s32_s29, [#allocation3], %s2716_s13, %s2716_s13, %s2717_s14  }
  0x19   :  { %s2718_s17 = smov [#allocation6]  }
  0x1a   :  { %s59_s18 = sshll.u32 %s2718_s17, 4  ;;  %s60_s18 = int_to_ptr.vmem [resolvable:$true] %s59_s18 }
  0x1b   :  { %s2696_s5 = scalar_lea.vmem %s60_s18, 3072  ;;  %p2701_p11 = scmp.lt.s32.totalorder %s60_s18, %s60_s18 }
  0x1c   :  { %p2697_p10 = scmp.ne.s32.totalorder %s60_s18, %s2696_s5  ;;  %p2702_p12 = scmp.lt.s32.totalorder %s2696_s5, %s2696_s5 }
  0x1e   :  { %p2703_p13 = por %p2702_p12, %p2701_p11 }
  0x20   :  { %p2704_p0 = pnand %p2703_p13, %p2697_p10 }
  0x22   :  { %2707 = shalt.err (!%p2704_p0)
}
  0x23   :  { %s2719_s19 = smov 192   ;;  %s2720_s20 = smov 12  }
  0x24   :  { %65 = dma.hbm_to_vmem [thread:$0]  %s3142_s7, 3072, %s60_s18, [#allocation5], %s2719_s19, %s2719_s19, %s2720_s20  }
  0x25   :  { %2708 = dma.done.wait [#allocation3], 7040  }
  0x26   :  { %2709 = vsyncadd [#allocation3], 4294960256 }
  0x27   :  { %2710 = dma.done.wait [#allocation5], 4096  }
  0x28   :  { %2711 = vsyncadd [#allocation5], 4294963200  ;;  %v2459_v0 = vld [vmem:[#allocation2 + $0x11c] ss:$20 sps:$4 sm:$0xff]   ;;  %v2461_v1 = vld [vmem:[#allocation2 + $0x118] ss:$20 sps:$4 sm:$0xff]  }
  0x29   :  { %479 = vmatprep.subr.bf16.mxu0 %v2459_v0  ;;  %v2462_v2 = vld [vmem:[#allocation2 + $0xf4] ss:$20 sps:$4 sm:$0xff]   ;;  %v2464_v3 = vld [vmem:[#allocation2 + $0xf0] ss:$20 sps:$4 sm:$0xff]   ;;  %v2465_v4 = vld [vmem:[#allocation2 + $0xcc] ss:$20 sps:$4 sm:$0xff]  }
  0x2a   :  { %480 = vmatpush1.bf16.msra.mxu0 %v2461_v1  ;;  %v2468_v5 = vld [vmem:[#allocation2 + $0x124] ss:$20 sps:$4 sm:$0xff]   ;;  %v2470_v6 = vld [vmem:[#allocation2 + $0x120] ss:$20 sps:$4 sm:$0xff]   ;;  %v2467_v7 = vld [vmem:[#allocation2 + $0xc8] ss:$20 sps:$4 sm:$0xff]  }
  0x2b   :  { %481 = vmatprep.subr.bf16.mxu0 %v2462_v2  ;;  %520 = vmatprep.subr.bf16.mxu1 %v2468_v5  ;;  %v2474_v8 = vld [vmem:[#allocation2 + $0xfc] ss:$20 sps:$4 sm:$0xff]   ;;  %v2476_v9 = vld [vmem:[#allocation2 + $0xf8] ss:$20 sps:$4 sm:$0xff]   ;;  %v2473_v11 = vld [vmem:[#allocation2 + $0xa0] ss:$20 sps:$4 sm:$0xff]  }
  0x2c   :  { %521 = vmatpush1.bf16.msra.mxu1 %v2470_v6  ;;  %v2471_v10 = vld [vmem:[#allocation2 + $0xa4] ss:$20 sps:$4 sm:$0xff]   ;;  %v2480_v12 = vld [vmem:[#allocation2 + $0xd4] ss:$20 sps:$4 sm:$0xff]   ;;  %v2477_v13 = vld [vmem:[#allocation2 + $0x7c] ss:$20 sps:$4 sm:$0xff]  }
  0x2d   :  { %522 = vmatprep.subr.bf16.mxu1 %v2474_v8  ;;  %v2482_v14 = vld [vmem:[#allocation2 + $0xd0] ss:$20 sps:$4 sm:$0xff]   ;;  %v2486_v15 = vld [vmem:[#allocation2 + $0xac] ss:$20 sps:$4 sm:$0xff]   ;;  %v2483_v17 = vld [vmem:[#allocation2 + $0x54] ss:$20 sps:$4 sm:$0xff]  }
  0x2e   :  { %482 = vmatpush1.bf16.msra.mxu0 %v2464_v3  ;;  %v2479_v16 = vld [vmem:[#allocation2 + $0x78] ss:$20 sps:$4 sm:$0xff]   ;;  %v2488_v18 = vld [vmem:[#allocation2 + $0xa8] ss:$20 sps:$4 sm:$0xff]   ;;  %v2485_v20 = vld [vmem:[#allocation2 + $0x50] ss:$20 sps:$4 sm:$0xff]  }
  0x2f   :  { %483 = vmatprep.subr.bf16.mxu0 %v2465_v4  ;;  %v2492_v19 = vld [vmem:[#allocation2 + $0x84] ss:$20 sps:$4 sm:$0xff]   ;;  %v2489_v21 = vld [vmem:[#allocation2 + $0x2c] ss:$20 sps:$4 sm:$0xff]   ;;  %v2498_v23 = vld [vmem:[#allocation2 + $0x5c] ss:$20 sps:$4 sm:$0xff]  }
  0x30   :  { %523 = vmatpush1.bf16.msra.mxu1 %v2476_v9  ;;  %v2494_v22 = vld [vmem:[#allocation2 + $0x80] ss:$20 sps:$4 sm:$0xff]   ;;  %v2491_v24 = vld [vmem:[#allocation2 + $0x28] ss:$20 sps:$4 sm:$0xff]   ;;  %v2495_v25 = vld [vmem:[#allocation2 + $0x4] ss:$20 sps:$4 sm:$0xff]  }
  0x31   :  { %524 = vmatprep.subr.bf16.mxu1 %v2480_v12  ;;  %v2500_v26 = vld [vmem:[#allocation2 + $0x58] ss:$20 sps:$4 sm:$0xff]   ;;  %v2504_v27 = vld [vmem:[#allocation2 + $0x34] ss:$20 sps:$4 sm:$0xff]   ;;  %v89_v30 = vld [vmem:[%s3135_s0] sm:$0xff]  ;;  %vm475_vm0 = vcmask 392192  }
  0x32   :  { %484 = vmatpush1.bf16.msra.mxu0 %v2467_v7  ;;  %v2497_v28 = vld [vmem:[#allocation2] ss:$20 sps:$4 sm:$0xff]   ;;  %v2506_v31 = vld [vmem:[#allocation2 + $0x30] ss:$20 sps:$4 sm:$0xff]   ;;  %v2110_v32 = vcombine.high %v89_v30, %v89_v30  ;;  %v2512_v36 = vld [vmem:[#allocation2 + $0x8] ss:$20 sps:$4 sm:$0xff]   ;;  %v2804_v45 = vcombine.low %v89_v30, %v89_v30 }
  0x33   :  { %485 = vmatprep.subr.bf16.mxu0 %v2471_v10  ;;  %v2501_v29 = vld [vmem:[#allocation2 + $0x194] ss:$20 sps:$4 sm:$0xff]   ;;  %v2510_v33 = vld [vmem:[#allocation2 + $0xc] ss:$20 sps:$4 sm:$0xff]   ;;  %v2503_v34 = vld [vmem:[#allocation2 + $0x190] ss:$20 sps:$4 sm:$0xff]  }
  0x34   :  { %525 = vmatpush1.bf16.msra.mxu1 %v2482_v14  ;;  %2166 = vmatprep.mubr.msk.bf16.mxu0 %vm475_vm0, %v2110_v32  ;;  %v2507_v35 = vld [vmem:[#allocation2 + $0x16c] ss:$20 sps:$4 sm:$0xff]   ;;  %v2516_v37 = vld [vmem:[#allocation2 + $0x19c] ss:$20 sps:$4 sm:$0xff]   ;;  %v2513_v39 = vld [vmem:[#allocation2 + $0x144] ss:$20 sps:$4 sm:$0xff]  }
  0x35   :  { %526 = vmatprep.subr.bf16.mxu1 %v2486_v15  ;;  %2167 = vmatprep.mubr.msk.bf16.mxu1 %vm475_vm0, %v2110_v32  ;;  %v2509_v38 = vld [vmem:[#allocation2 + $0x168] ss:$20 sps:$4 sm:$0xff]   ;;  %v2519_v40 = vld [vmem:[#allocation2 + $0x198] ss:$20 sps:$4 sm:$0xff]   ;;  %v2515_v42 = vld [vmem:[#allocation2 + $0x140] ss:$20 sps:$4 sm:$0xff]  }
  0x36   :  { %486 = vmatpush1.bf16.msra.mxu0 %v2473_v11  ;;  %v2522_v41 = vld [vmem:[#allocation2 + $0x174] ss:$20 sps:$4 sm:$0xff]   ;;  %v2524_v43 = vld [vmem:[#allocation2 + $0x170] ss:$20 sps:$4 sm:$0xff]   ;;  %v2526_v44 = vld [vmem:[#allocation2 + $0x14c] ss:$20 sps:$4 sm:$0xff]  }
  0x37   :  { %487 = vmatprep.subr.bf16.mxu0 %v2477_v13  ;;  %v2521_v46 = vld [vmem:[#allocation2 + $0x128] ss:$20 sps:$4 sm:$0xff]   ;;  %v2721_v48 = vmov 0   ;;  %v2530_v49 = vld [vmem:[#allocation4 + $0x38] sm:$0xff]   ;;  %v2812_v52 = vld [vmem:[%s3137_s2] sm:$0xf] }
  0x38   :  { %527 = vmatpush1.bf16.msra.mxu1 %v2488_v18  ;;  %v2528_v47 = vld [vmem:[#allocation2 + $0x148] ss:$20 sps:$4 sm:$0xff]   ;;  %v2525_v50 = vld [vmem:[#allocation2 + $0x100] ss:$20 sps:$4 sm:$0xff]   ;;  %v2817_v53 = vld [vmem:[%s3137_s2 + $0x4] sm:$0xf] }
  0x39   :  { %528 = vmatprep.subr.bf16.mxu1 %v2492_v19  ;;  %v2532_v51 = vld [vmem:[#allocation4 + $0x30] sm:$0xff]   ;;  %v2169_v54 = vcombine.low %v2812_v52, %v2817_v53  ;;  %v2534_v56 = vld [vmem:[#allocation4 + $0x28] sm:$0xff]   ;;  %v2536_v58 = vld [vmem:[#allocation4 + $0x20] sm:$0xff]   ;;  %v2722_v15 = vmov 0.0   ;;  %vm2723_vm1 = vmmov 0   ;;  %vm1196_vm2 = vcmask 64512  }
  0x3a   :  { %488 = vmatpush1.bf16.msra.mxu0 %v2479_v16  ;;  %v2529_v55 = vld [vmem:[#allocation2 + $0xd8] ss:$20 sps:$4 sm:$0xff]   ;;  %v2531_v57 = vld [vmem:[#allocation2 + $0xb0] ss:$20 sps:$4 sm:$0xff]   ;;  %v2533_v59 = vld [vmem:[#allocation2 + $0x88] ss:$20 sps:$4 sm:$0xff]  }
  0x3b   :  { %489 = vmatprep.subr.bf16.mxu0 %v2483_v17  ;;  %v2538_v60 = vld [vmem:[#allocation4 + $0x18] sm:$0xff]   ;;  %v2540_v62 = vld [vmem:[#allocation4 + $0x10] sm:$0xff]   ;;  %v2542_v0 = vld [vmem:[#allocation4 + $0x8] sm:$0xff]   ;;  %vm1305_vm3 = vcmask 1043456   ;;  %vm1285_vm4 = vcmask 57344   ;;  %vm1728_vm5 = vcmask 1041409  }
  0x3c   :  { %529 = vmatpush1.bf16.msra.mxu1 %v2494_v22  ;;  %v2535_v61 = vld [vmem:[#allocation2 + $0x60] ss:$20 sps:$4 sm:$0xff]   ;;  %v2537_v63 = vld [vmem:[#allocation2 + $0x38] ss:$20 sps:$4 sm:$0xff]   ;;  %v2539_v1 = vld [vmem:[#allocation2 + $0x10] ss:$20 sps:$4 sm:$0xff]  }
  0x3d   :  { %530 = vmatprep.subr.bf16.mxu1 %v2498_v23  ;;  %v2544_v2 = vld [vmem:[#allocation4] sm:$0xff]   ;;  %v2541_v3 = vld [vmem:[#allocation2 + $0x1a0] ss:$20 sps:$4 sm:$0xff]   ;;  %v2832_v4 = vld [vmem:[%s3137_s2 + $0x8] sm:$0xf]  ;;  %vm1731_vm6 = vcmask 1042434  }
  0x3e   :  { %490 = vmatpush1.bf16.msra.mxu0 %v2485_v20  ;;  %v2837_v5 = vld [vmem:[%s3137_s2 + $0xc] sm:$0xf]  ;;  %v2843_v6 = vld [vmem:[%s3137_s2 + $0x10] sm:$0xf]  ;;  %v2848_v7 = vld [vmem:[%s3137_s2 + $0x14] sm:$0xf] }
  0x3f   :  { %491 = vmatprep.subr.bf16.mxu0 %v2489_v21  ;;  %v2170_v8 = vcombine.low %v2832_v4, %v2837_v5  ;;  %v2543_v9 = vld [vmem:[#allocation2 + $0x178] ss:$20 sps:$4 sm:$0xff]   ;;  %v2171_v10 = vcombine.low %v2843_v6, %v2848_v7  ;;  %v2545_v11 = vld [vmem:[#allocation2 + $0x150] ss:$20 sps:$4 sm:$0xff]   ;;  %v2863_v13 = vld [vmem:[%s3137_s2 + $0x1c] sm:$0xf] }
  0x40   :  { %531 = vmatpush1.bf16.msra.mxu1 %v2500_v26  ;;  %v2858_v12 = vld [vmem:[%s3137_s2 + $0x18] sm:$0xf]  ;;  %v2724_v26 = vmov 1966171168   ;;  %vm1734_vm7 = vcmask 1043459   ;;  %vm1737_vm8 = vcmask 1044484  }
  0x41   :  { %532 = vmatprep.subr.bf16.mxu1 %v2504_v27  ;;  %v2172_v14 = vcombine.low %v2858_v12, %v2863_v13  ;;  %v757_v27 = vunpack.c.l.s4 %v2724_v26  ;;  %v868_v26 = vld [vmem:[%s3141_s6] sm:$0xf]  ;;  %vm1740_vm9 = vcmask 1045509   ;;  %vm1743_vm10 = vcmask 1046534  }
  0x42   :  { %492 = vmatpush1.bf16.msra.mxu0 %v2491_v24  ;;  %v158_v24 = vlaneseq  ;;  %vm1746_vm11 = vcmask 1047559  }
  0x43   :  { %493 = vmatprep.subr.bf16.mxu0 %v2495_v25  ;;  %v758_v30 = vunpack.c.0.s8 %v757_v27 }
  0x44   :  { %533 = vmatpush1.bf16.msra.mxu1 %v2506_v31  ;;  %v2883_v25 = vshrl.u32 %v158_v24, 7 }
  0x45   :  { %534 = vmatprep.subr.bf16.mxu1 %v2510_v33 }
  0x46   :  { %494 = vmatpush1.bf16.msra.mxu0 %v2497_v28 }
  0x47   :  { %505 = vmatprep.subr.bf16.mxu0 %v2501_v29  ;;  %v176_v29 = vsub.s32 4, %v2883_v25 }
  0x48   :  { %535 = vmatpush1.bf16.msra.mxu1 %v2512_v36 }
  0x49   :  { %546 = vmatprep.subr.bf16.mxu1 %v2516_v37 }
  0x4a   :  { %506 = vmatpush2.bf16.msra.mxu0 %v2503_v34  ;;  %v761_v34 = vsub.s32 %v758_v30, %v2883_v25 }
  0x4b   :  { %507 = vmatprep.subr.bf16.mxu0 %v2507_v35 }
  0x4c   :  { %547 = vmatpush2.bf16.msra.mxu1 %v2519_v40 }
  0x4d   :  { %548 = vmatprep.subr.bf16.mxu1 %v2522_v41 }
  0x4e   :  { %508 = vmatpush2.bf16.msra.mxu0 %v2509_v38 }
  0x4f   :  { %509 = vmatprep.subr.bf16.mxu0 %v2513_v39 }
  0x50   :  { %549 = vmatpush2.bf16.msra.mxu1 %v2524_v43  ;;  %v2894_v43 = vsub.s32 0, %v2883_v25 }
  0x51   :  { %550 = vmatprep.subr.bf16.mxu1 %v2526_v44 }
  0x52   :  { %510 = vmatpush2.bf16.msra.mxu0 %v2515_v42 }
  0x53   :  { %561 = vmatprep.subr.bf16.mxu0 %v2721_v48 }
  0x54   :  { %551 = vmatpush2.bf16.msra.mxu1 %v2528_v47 }
  0x55   :  { %512 = vmatmul.mubr.bf16.vlgmr.msra.gmra.mxu0 %v2804_v45  ;;  %2286 = vmatprep.subr.bf16.mxu1 %v2530_v49 }
  0x56   :  { %562 = vmatpush1.bf16.msra.mxu0 %v2521_v46  ;;  %2168 = vmatprep.mubr.msk.bf16.mxu0 %vm475_vm0, %v2110_v32  ;;  %v2889_v32 = vld [vmem:[%s3139_s4] sm:$0x1f] }
  0x57   :  { %563 = vmatprep.subr.bf16.mxu0 %v2721_v48  ;;  %553 = vmatmul.mubr.bf16.vlgmr.msra.gmra.mxu1 %v2804_v45  ;;  %v177_v33 = vrot.slane %v2889_v32, %v176_v29 }
  0x58   :  { %2287 = vmatpush3.bf16.msra.mxu1 %v2530_v49  ;;  %2302 = vmatprep.mubr.bf16.mxu1 %v2169_v54 }
  0x59   :  { %2288 = vmatprep.subr.bf16.mxu1 %v2532_v51 }
  0x5a   :  { %564 = vmatpush1.bf16.msra.mxu0 %v2525_v50 }
  0x5b   :  { %565 = vmatprep.subr.bf16.mxu0 %v2721_v48 }
  0x5c   :  { %2289 = vmatpush3.bf16.msra.mxu1 %v2532_v51 }
  0x5d   :  { %2290 = vmatprep.subr.bf16.mxu1 %v2534_v56 }
  0x5e   :  { %566 = vmatpush1.bf16.msra.mxu0 %v2529_v55 }
  0x5f   :  { %567 = vmatprep.subr.bf16.mxu0 %v2721_v48 }
  0x60   :  { %2291 = vmatpush3.bf16.msra.mxu1 %v2534_v56 }
  0x61   :  { %2292 = vmatprep.subr.bf16.mxu1 %v2536_v58 }
  0x62   :  { %568 = vmatpush1.bf16.msra.mxu0 %v2531_v57 }
  0x63   :  { %569 = vmatprep.subr.bf16.mxu0 %v2721_v48 }
  0x64   :  { %2293 = vmatpush3.bf16.msra.mxu1 %v2536_v58 }
  0x65   :  { %2294 = vmatprep.subr.bf16.mxu1 %v2538_v60 }
  0x66   :  { %570 = vmatpush1.bf16.msra.mxu0 %v2533_v59 }
  0x67   :  { %571 = vmatprep.subr.bf16.mxu0 %v2721_v48 }
  0x68   :  { %2295 = vmatpush3.bf16.msra.mxu1 %v2538_v60 }
  0x69   :  { %2296 = vmatprep.subr.bf16.mxu1 %v2540_v62 }
  0x6a   :  { %572 = vmatpush1.bf16.msra.mxu0 %v2535_v61 }
  0x6b   :  { %573 = vmatprep.subr.bf16.mxu0 %v2721_v48 }
  0x6c   :  { %2297 = vmatpush3.bf16.msra.mxu1 %v2540_v62 }
  0x6d   :  { %2298 = vmatprep.subr.bf16.mxu1 %v2542_v0 }
  0x6e   :  { %574 = vmatpush1.bf16.msra.mxu0 %v2537_v63 }
  0x6f   :  { %575 = vmatprep.subr.bf16.mxu0 %v2721_v48 }
  0x70   :  { %2299 = vmatpush3.bf16.msra.mxu1 %v2542_v0 }
  0x71   :  { %2300 = vmatprep.subr.bf16.mxu1 %v2544_v2 }
  0x72   :  { %576 = vmatpush1.bf16.msra.mxu0 %v2539_v1 }
  0x73   :  { %587 = vmatprep.subr.bf16.mxu0 %v2721_v48 }
  0x74   :  { %2301 = vmatpush3.bf16.msra.mxu1 %v2544_v2 }
  0x75   :  { %2334 = vmatprep.subr.bf16.mxu1 %v2722_v15 }
  0x76   :  { %588 = vmatpush2.bf16.msra.mxu0 %v2541_v3 }
  0x77   :  { %589 = vmatprep.subr.bf16.mxu0 %v2721_v48  ;;  %2303 = vmatmul.mubr.bf16.vlgmr.msra.gmra.mxu1 %v2170_v8 }
  0x78   :  { %2306 = vmatprep.mubr.bf16.mxu1 %v2171_v10 }
  0x7a   :  { %590 = vmatpush2.bf16.msra.mxu0 %v2543_v9 }
  0x7b   :  { %591 = vmatprep.subr.bf16.mxu0 %v2721_v48 }
  0x7e   :  { %592 = vmatpush2.bf16.msra.mxu0 %v2545_v11 }
  0x7f   :  { %2307 = vmatmul.mubr.bf16.gmra.mxu1 %v2172_v14  ;;  %2310 = vmatprep.subr.bf16.mxu0 %v2722_v15 }
  0x80   :  { %2336 = vmatprep.mubr.msk.bf16.mxu1 %vm2723_vm1, %v2722_v15 }
  0x81   :  { %594 = vmatmul.mubr.bf16.vlgmr.msra.gmra.mxu0 %v2804_v45 }
  0x82   :  { %2312 = vmatprep.mubr.msk.bf16.mxu0 %vm2723_vm1, %v2722_v15 }
 0x115   :  { %v2875_v16 = vpop.f32.mrf.mxu0 }
 0x117   :  { %v2877_v17 = vpop.f32.mrf.mxu0  ;;  %v2879_v19 = vpop.f32.mrf.mxu1 }
 0x119   :  { %v517_v18 = vpop.f32.mrf.mxu0  ;;  %v2881_v21 = vpop.f32.mrf.mxu1 }
 0x11b   :  { %v518_v20 = vpop.f32.mrf.mxu0  ;;  %v558_v22 = vpop.f32.mrf.mxu1 }
 0x11d   :  { %v559_v23 = vpop.f32.mrf.mxu1 }
 0x137   :  { %v2304_v28 = vpop.f32.mrf.mxu1 }
 0x139   :  { %v723_v31 = vpop.f32.mrf.mxu1 }
 0x13b   :  { %v2305_v35 = vpop.f32.mrf.mxu1 }
 0x13d   :  { %v726_v41 = vpop.f32.mrf.mxu1 }
 0x13f   :  { %v2308_v51 = vpop.f32.mrf.mxu1 }
 0x141   :  { %v595_v36 = vpop.f32.mrf.mxu0  ;;  %v739_v59 = vpop.f32.mrf.mxu1 }
 0x142   :  { %v596_v37 = vadd.f32 %v595_v36, %v177_v33 }
 0x143   :  { %v597_v38 = vpop.f32.mrf.mxu0  ;;  %v2309_v24 = vpop.f32.mrf.mxu1 }
 0x144   :  { %v755_v39 = vcombine.high %v596_v37, %v596_v37  ;;  %v762_v40 = vrot.slane %v596_v37, %v761_v34  ;;  %v869_v37 = vld [vmem:[%s3141_s6 + $0x4] sm:$0xf] }
 0x145   :  { %v598_v42 = vpop.f32.mrf.mxu0  ;;  %v742_v30 = vpop.f32.mrf.mxu1 }
 0x146   :  { %v769_v44 = vrot.slane %v755_v39, %v761_v34  ;;  %v770_v45 = vcombine.high %v762_v40, %v762_v40  ;;  %v778_v46 = vrot.slane %v762_v40, %v761_v34  ;;  %v874_v40 = vld [vmem:[%s3141_s6 + $0x18] sm:$0xf] }
 0x147   :  { %v599_v47 = vpop.f32.mrf.mxu0 }
 0x148   :  { %v807_v49 = vrot.slane %v778_v46, %v2894_v43  ;;  %v792_v50 = vrot.slane %v770_v45, %v761_v34  ;;  %v785_v54 = vrot.slane %v769_v44, %v761_v34  ;;  %v800_v62 = vcombine.high %v778_v46, %v778_v46  ;;  %v871_v47 = vld [vmem:[%s3141_s6 + $0xc] sm:$0xf] }
 0x149   :  { %v771_v9 = vcombine.high %v769_v44, %v769_v44  ;;  %v870_v44 = vld [vmem:[%s3141_s6 + $0x8] sm:$0xf] }
 0x14a   :  { %v844_v55 = vadd.f32 %v807_v49, %v723_v31  ;;  %v811_v56 = vrot.slane %v792_v50, %v2894_v43  ;;  %v801_v57 = vcombine.high %v785_v54, %v785_v54  ;;  %v823_v58 = vrot.slane %v785_v54, %v2894_v43  ;;  %v872_v31 = vld [vmem:[%s3141_s6 + $0x10] sm:$0xf] }
 0x14b   :  { %v815_v1 = vrot.slane %v800_v62, %v2894_v43  ;;  %v802_v3 = vcombine.high %v792_v50, %v792_v50  ;;  %v799_v22 = vrot.slane %v771_v9, %v761_v34 }
 0x14c   :  { %2590 = vtanh.f32 %v844_v55  ;;  %v831_v60 = vrot.slane %v801_v57, %v2894_v43  ;;  %v848_v61 = vadd.f32 %v823_v58, %v739_v59  ;;  %v845_v63 = vadd.f32 %v811_v56, %v726_v41  ;;  %v875_v55 = vld [vmem:[%s3141_s6 + $0x1c] sm:$0xf] }
 0x14d   :  { %v846_v2 = vadd.f32 %v2304_v28, %v815_v1  ;;  %v819_v11 = vrot.slane %v802_v3, %v2894_v43  ;;  %v827_v29 = vrot.slane %v799_v22, %v2894_v43  ;;  %v803_v34 = vcombine.high %v799_v22, %v799_v22 }
 0x14e   :  { %2592 = vtanh.f32 %v848_v61  ;;  %v850_v0 = vadd.f32 %v2308_v51, %v831_v60  ;;  %v873_v51 = vld [vmem:[%s3141_s6 + $0x14] sm:$0xf] }
 0x14f   :  { %2594 = vtanh.f32 %v845_v63  ;;  %v847_v20 = vadd.f32 %v2305_v35, %v819_v11  ;;  %v849_v35 = vadd.f32 %v827_v29, %v742_v30  ;;  %v835_v38 = vrot.slane %v803_v34, %v2894_v43 }
 0x150   :  { %2596 = vtanh.f32 %v850_v0 }
 0x151   :  { %2598 = vtanh.f32 %v846_v2  ;;  %v851_v41 = vadd.f32 %v2309_v24, %v835_v38 }
 0x152   :  { %2600 = vtanh.f32 %v847_v20 }
 0x153   :  { %2602 = vtanh.f32 %v849_v35 }
 0x154   :  { %2604 = vtanh.f32 %v851_v41 }
 0x159   :  { %v2591_v8 = vpop.eup %2590 }
 0x15a   :  { %v860_v10 = vpack.c.bf16 %v2591_v8, %v2591_v8 }
 0x15b   :  { %v2593_v14 = vpop.eup %2592 }
 0x15c   :  { %2311 = vmatpush3.bf16.xpose.msra.mxu0 %v860_v10  ;;  %v864_v18 = vpack.c.bf16 %v2593_v14, %v2593_v14  ;;  %v2595_v23 = vpop.eup %2594 }
 0x15d   :  { %2316 = vmatprep.subr.bf16.mxu0 %v2722_v15  ;;  %v2597_v27 = vpop.eup %2596  ;;  %v861_v28 = vpack.c.bf16 %v2595_v23, %v2595_v23 }
 0x15e   :  { %2335 = vmatpush3.bf16.xpose.msra.mxu1 %v864_v18  ;;  %v866_v33 = vpack.c.bf16 %v2597_v27, %v2597_v27  ;;  %v2599_v36 = vpop.eup %2598 }
 0x15f   :  { %2346 = vmatprep.subr.bf16.mxu1 %v2722_v15  ;;  %v862_v39 = vpack.c.bf16 %v2599_v36, %v2599_v36  ;;  %v2601_v42 = vpop.eup %2600 }
 0x160   :  { %v863_v45 = vpack.c.bf16 %v2601_v42, %v2601_v42  ;;  %v2603_v46 = vpop.eup %2602 }
 0x161   :  { %v865_v49 = vpack.c.bf16 %v2603_v46, %v2603_v46  ;;  %v2605_v50 = vpop.eup %2604 }
 0x162   :  { %v867_v54 = vpack.c.bf16 %v2605_v50, %v2605_v50 }
 0x163   :  { %2313 = vmatmul.mubr.bf16.vlgmr.msra.gmra.mxu0 %v868_v26 }
 0x164   :  { %2317 = vmatpush3.bf16.xpose.msra.mxu0 %v861_v28  ;;  %2318 = vmatprep.mubr.msk.bf16.mxu0 %vm2723_vm1, %v2722_v15 }
 0x165   :  { %2322 = vmatprep.subr.bf16.mxu0 %v2722_v15  ;;  %2337 = vmatmul.mubr.bf16.vlgmr.msra.gmra.mxu1 %v872_v31 }
 0x166   :  { %2347 = vmatpush3.bf16.xpose.msra.mxu1 %v866_v33  ;;  %2348 = vmatprep.mubr.msk.bf16.mxu1 %vm2723_vm1, %v2722_v15 }
 0x167   :  { %2358 = vmatprep.subr.bf16.mxu1 %v2722_v15 }
 0x16b   :  { %2319 = vmatmul.mubr.bf16.vlgmr.msra.gmra.mxu0 %v869_v37 }
 0x16c   :  { %2323 = vmatpush3.bf16.xpose.msra.mxu0 %v862_v39  ;;  %2324 = vmatprep.mubr.msk.bf16.mxu0 %vm2723_vm1, %v2722_v15 }
 0x16d   :  { %2328 = vmatprep.subr.bf16.mxu0 %v2722_v15  ;;  %2349 = vmatmul.mubr.bf16.vlgmr.msra.gmra.mxu1 %v874_v40 }
 0x16e   :  { %2360 = vmatprep.mubr.msk.bf16.mxu1 %vm2723_vm1, %v2722_v15 }
 0x173   :  { %2325 = vmatmul.mubr.bf16.vlgmr.msra.gmra.mxu0 %v870_v44 }
 0x174   :  { %2329 = vmatpush3.bf16.xpose.msra.mxu0 %v863_v45  ;;  %2330 = vmatprep.mubr.msk.bf16.mxu0 %vm2723_vm1, %v2722_v15 }
 0x175   :  { %2340 = vmatprep.subr.bf16.mxu0 %v2722_v15 }
 0x17b   :  { %2331 = vmatmul.mubr.bf16.vlgmr.msra.gmra.mxu0 %v871_v47 }
 0x17c   :  { %2341 = vmatpush3.bf16.xpose.msra.mxu0 %v865_v49  ;;  %2342 = vmatprep.mubr.msk.bf16.mxu0 %vm2723_vm1, %v2722_v15 }
 0x17d   :  { %2352 = vmatprep.subr.bf16.mxu0 %v2722_v15 }
 0x183   :  { %2343 = vmatmul.mubr.bf16.vlgmr.msra.gmra.mxu0 %v873_v51 }
 0x184   :  { %2353 = vmatpush3.bf16.xpose.msra.mxu0 %v867_v54  ;;  %2354 = vmatprep.mubr.msk.bf16.mxu0 %vm2723_vm1, %v2722_v15 }
 0x185   :  { %2364 = vmatprep.subr.bf16.mxu0 %v2722_v15 }
 0x18b   :  { %2355 = vmatmul.mubr.bf16.vlgmr.msra.gmra.mxu0 %v875_v55 }
 0x18c   :  { %2366 = vmatprep.mubr.msk.bf16.mxu0 %vm2723_vm1, %v2722_v15 }
 0x223   :  { %v910_v56 = vpop.f32.mrf.mxu0 }
 0x224   :  { %v1197_v57 = vsel %vm1196_vm2, %v910_v56, -inf }
 0x225   :  { %1198 = vmax.xlane.f32.xlu0 %v1197_v57  ;;  %v2314_v58 = vpop.f32.mrf.mxu0  ;;  %v1070_v59 = vpop.f32.mrf.mxu1 }
 0x226   :  { %v1209_v8 = vsel %vm1196_vm2, %v1070_v59, -inf }
 0x227   :  { %v913_v60 = vpop.f32.mrf.mxu0  ;;  %v2338_v61 = vpop.f32.mrf.mxu1 }
 0x229   :  { %v2315_v62 = vpop.f32.mrf.mxu0  ;;  %v1073_v63 = vpop.f32.mrf.mxu1 }
 0x22b   :  { %v950_v0 = vpop.f32.mrf.mxu0  ;;  %v2339_v2 = vpop.f32.mrf.mxu1 }
 0x22c   :  { %v1200_v1 = vsel %vm1196_vm2, %v950_v0, -inf }
 0x22d   :  { %1201 = vmax.xlane.f32.xlu0 %v1200_v1  ;;  %v2320_v3 = vpop.f32.mrf.mxu0  ;;  %v1150_v9 = vpop.f32.mrf.mxu1 }
 0x22e   :  { %v1215_v18 = vsel %vm1196_vm2, %v1150_v9, -inf }
 0x22f   :  { %v953_v10 = vpop.f32.mrf.mxu0  ;;  %v2350_v11 = vpop.f32.mrf.mxu1 }
 0x231   :  { %v2321_v14 = vpop.f32.mrf.mxu0  ;;  %1210 = vmax.xlane.f32.xlu0 %v1209_v8  ;;  %v1153_v20 = vpop.f32.mrf.mxu1 }
 0x233   :  { %v990_v22 = vpop.f32.mrf.mxu0  ;;  %v2351_v24 = vpop.f32.mrf.mxu1 }
 0x234   :  { %v1203_v23 = vsel %vm1196_vm2, %v990_v22, -inf }
 0x235   :  { %1204 = vmax.xlane.f32.xlu1 %v1203_v23  ;;  %v2326_v26 = vpop.f32.mrf.mxu0  ;;  %1216 = vmax.xlane.f32.xlu0 %v1215_v18 }
 0x236   :  { %v1307_v26 = vsel %vm1305_vm3, %v2812_v52, 0 }
 0x237   :  { %v993_v27 = vpop.f32.mrf.mxu0  ;;  %2359 = vmatpush3.bf16.msra.mxu1 %v1307_v26  ;;  %v2557_v26 = vld [vmem:[#allocation6 + $0x98] ss:$12 sps:$4 sm:$0xff]  }
 0x238   :  { %2370 = vmatprep.subr.bf16.mxu1 %v2722_v15 }
 0x239   :  { %v2327_v28 = vpop.f32.mrf.mxu0 }
 0x23b   :  { %v1030_v29 = vpop.f32.mrf.mxu0 }
 0x23c   :  { %v1206_v30 = vsel %vm1196_vm2, %v1030_v29, -inf }
 0x23d   :  { %1207 = vmax.xlane.f32.xlu1 %v1206_v30  ;;  %v2332_v31 = vpop.f32.mrf.mxu0 }
 0x23f   :  { %v1033_v33 = vpop.f32.mrf.mxu0 }
 0x241   :  { %v2333_v34 = vpop.f32.mrf.mxu0 }
 0x243   :  { %v1110_v35 = vpop.f32.mrf.mxu0 }
 0x244   :  { %v1212_v36 = vsel %vm1196_vm2, %v1110_v35, -inf }
 0x245   :  { %1213 = vmax.xlane.f32.xlu1 %v1212_v36  ;;  %v2344_v37 = vpop.f32.mrf.mxu0 }
 0x246   :  { %v1353_v37 = vsel %vm1305_vm3, %v2817_v53, 0 }
 0x247   :  { %v1113_v38 = vpop.f32.mrf.mxu0  ;;  %2365 = vmatpush3.bf16.msra.mxu0 %v1353_v37  ;;  %v2572_v37 = vld [vmem:[#allocation6 + $0x34] ss:$12 sps:$4 sm:$0xff]  }
 0x248   :  { %2376 = vmatprep.subr.bf16.mxu0 %v2722_v15 }
 0x249   :  { %v2345_v39 = vpop.f32.mrf.mxu0 }
 0x24b   :  { %v1190_v40 = vpop.f32.mrf.mxu0 }
 0x24c   :  { %v1218_v41 = vsel %vm1196_vm2, %v1190_v40, -inf }
 0x24d   :  { %1219 = vmax.xlane.f32.xlu1 %v1218_v41  ;;  %v2356_v42 = vpop.f32.mrf.mxu0 }
 0x24f   :  { %v1193_v44 = vpop.f32.mrf.mxu0 }
 0x251   :  { %v2357_v45 = vpop.f32.mrf.mxu0 }
 0x252   :  { %v1399_v45 = vsel %vm1305_vm3, %v2832_v4, 0 }
 0x2ae   :  { %v1199_v46 = vpop.xlane.xlu0 %1198 }
 0x2af   :  { %v1221_v47 = vsub.f32 %v910_v56, %v1199_v46 }
 0x2b1   :  { %v1229_v49 = vmul.f32 1.442695, %v1221_v47 }
 0x2b3   :  { %2606 = vpow2.f32 %v1229_v49 }
 0x2b6   :  { %v1202_v50 = vpop.xlane.xlu0 %1201 }
 0x2b7   :  { %v1222_v51 = vsub.f32 %v950_v0, %v1202_v50 }
 0x2b9   :  { %v1231_v54 = vmul.f32 1.442695, %v1222_v51 }
 0x2ba   :  { %v1211_v55 = vpop.xlane.xlu0 %1210 }
 0x2bb   :  { %2608 = vpow2.f32 %v1231_v54  ;;  %v1225_v57 = vsub.f32 %v1070_v59, %v1211_v55  ;;  %v1445_v54 = vsel %vm1305_vm3, %v2837_v5, 0 }
 0x2bd   :  { %v1237_v63 = vmul.f32 1.442695, %v1225_v57 }
 0x2be   :  { %v1205_v58 = vpop.xlane.xlu1 %1204  ;;  %v1217_v60 = vpop.xlane.xlu0 %1216 }
 0x2bf   :  { %v1223_v61 = vsub.f32 %v990_v22, %v1205_v58  ;;  %v1227_v2 = vsub.f32 %v1150_v9, %v1217_v60  ;;  %v1491_v60 = vsel %vm1305_vm3, %v2843_v6, 0 }
 0x2c0   :  { %v2607_v62 = vpop.eup %2606 }
 0x2c1   :  { %v1233_v1 = vmul.f32 1.442695, %v1223_v61  ;;  %v1245_v3 = vsel %vm1196_vm2, %v2607_v62, 0.0  ;;  %v1241_v56 = vmul.f32 1.442695, %v1227_v2 }
 0x2c2   :  { %1246 = vadd.xlane.f32.xlu0 %v1245_v3 }
 0x2c3   :  { %2610 = vpow2.f32 %v1233_v1 }
 0x2c4   :  { %2612 = vpow2.f32 %v1237_v63 }
 0x2c5   :  { %2614 = vpow2.f32 %v1241_v56 }
 0x2c6   :  { %v1208_v8 = vpop.xlane.xlu1 %1207 }
 0x2c7   :  { %v1224_v10 = vsub.f32 %v1030_v29, %v1208_v8  ;;  %v1583_v8 = vsel %vm1305_vm3, %v2858_v12, 0 }
 0x2c8   :  { %v2609_v0 = vpop.eup %2608 }
 0x2c9   :  { %v1235_v11 = vmul.f32 1.442695, %v1224_v10  ;;  %v1248_v59 = vsel %vm1196_vm2, %v2609_v0, 0.0 }
 0x2ca   :  { %1249 = vadd.xlane.f32.xlu1 %v1248_v59 }
 0x2cb   :  { %2616 = vpow2.f32 %v1235_v11 }
 0x2ce   :  { %v1214_v14 = vpop.xlane.xlu1 %1213 }
 0x2cf   :  { %v1226_v18 = vsub.f32 %v1110_v35, %v1214_v14  ;;  %v1629_v14 = vsel %vm1305_vm3, %v2863_v13, 0 }
 0x2d0   :  { %v2962_v20 = vpop.eup %2610 }
 0x2d1   :  { %v1239_v9 = vmul.f32 1.442695, %v1226_v18  ;;  %v1251_v22 = vsel %vm1196_vm2, %v2962_v20, 0.0  ;;  %v2966_v23 = vpop.eup %2612 }
 0x2d2   :  { %1252 = vadd.xlane.f32.xlu0 %v1251_v22  ;;  %v1257_v24 = vsel %vm1196_vm2, %v2966_v23, 0.0  ;;  %v2972_v27 = vpop.eup %2614  ;;  %v2553_v22 = vld [vmem:[#allocation6 + $0xb0] ss:$12 sps:$4 sm:$0xff]  }
 0x2d3   :  { %2618 = vpow2.f32 %v1239_v9  ;;  %v1263_v33 = vsel %vm1196_vm2, %v2972_v27, 0.0  ;;  %v2550_v9 = vld [vmem:[#allocation6 + $0xa8] ss:$12 sps:$4 sm:$0xff]  }
 0x2d6   :  { %1258 = vadd.xlane.f32.xlu0 %v1257_v24  ;;  %v1220_v28 = vpop.xlane.xlu1 %1219  ;;  %v2554_v24 = vld [vmem:[#allocation6 + $0x90] ss:$12 sps:$4 sm:$0xff]  }
 0x2d7   :  { %v1228_v29 = vsub.f32 %v1190_v40, %v1220_v28  ;;  %v2558_v28 = vld [vmem:[#allocation6 + $0x78] ss:$12 sps:$4 sm:$0xff]  }
 0x2d8   :  { %v2975_v30 = vpop.eup %2616 }
 0x2d9   :  { %v1243_v31 = vmul.f32 1.442695, %v1228_v29  ;;  %v1254_v34 = vsel %vm1196_vm2, %v2975_v30, 0.0  ;;  %v2561_v29 = vld [vmem:[#allocation6 + $0x80] ss:$12 sps:$4 sm:$0xff]  }
 0x2da   :  { %1264 = vadd.xlane.f32.xlu0 %v1263_v33  ;;  %1255 = vadd.xlane.f32.xlu1 %v1254_v34  ;;  %v2565_v33 = vld [vmem:[#allocation6 + $0x68] ss:$12 sps:$4 sm:$0xff]   ;;  %v2568_v34 = vld [vmem:[#allocation6 + $0x4c] ss:$12 sps:$4 sm:$0xff]  }
 0x2db   :  { %2620 = vpow2.f32 %v1243_v31  ;;  %v2564_v31 = vld [vmem:[#allocation6 + $0x64] ss:$12 sps:$4 sm:$0xff]  }
 0x2e0   :  { %v2981_v52 = vpop.eup %2618 }
 0x2e1   :  { %v1260_v35 = vsel %vm1196_vm2, %v2981_v52, 0.0 }
 0x2e2   :  { %1261 = vadd.xlane.f32.xlu1 %v1260_v35  ;;  %v2569_v35 = vld [vmem:[#allocation6 + $0x50] ss:$12 sps:$4 sm:$0xff]  }
 0x2e8   :  { %v2985_v36 = vpop.eup %2620 }
 0x2e9   :  { %v1266_v38 = vsel %vm1196_vm2, %v2985_v36, 0.0 }
 0x2ea   :  { %1267 = vadd.xlane.f32.xlu1 %v1266_v38  ;;  %v2573_v38 = vld [vmem:[#allocation6 + $0x38] ss:$12 sps:$4 sm:$0xff]  }
 0x34b   :  { %v1247_v39 = vpop.xlane.xlu0 %1246 }
 0x34c   :  { %2622 = vrcp.f32 %v1247_v39  ;;  %v2576_v39 = vld [vmem:[#allocation6 + $0x1c] ss:$12 sps:$4 sm:$0xff]  }
 0x353   :  { %v1250_v40 = vpop.xlane.xlu1 %1249 }
 0x354   :  { %2624 = vrcp.f32 %v1250_v40  ;;  %v2574_v40 = vld [vmem:[#allocation6 + $0x18] ss:$12 sps:$4 sm:$0xff]  }
 0x359   :  { %v2623_v41 = vpop.eup %2622 }
 0x35a   :  { %v1277_v42 = vmul.f32 %v2623_v41, %v2607_v62  ;;  %v2577_v41 = vld [vmem:[#allocation6 + $0x20] ss:$12 sps:$4 sm:$0xff]  }
 0x35b   :  { %v1253_v44 = vpop.xlane.xlu0 %1252 }
 0x35c   :  { %2626 = vrcp.f32 %v1253_v44  ;;  %1286 = vst.msk [vmem:[%s3147_s12] sm:$0x1] %vm1285_vm4, %v1277_v42  ;;  %v1294_v53 = vpack.c.bf16 %v1277_v42, %v1277_v42  ;;  %v2578_v42 = vld [vmem:[#allocation6] ss:$12 sps:$4 sm:$0xff]   ;;  %v2580_v44 = vld [vmem:[#allocation6 + $0x4] ss:$12 sps:$4 sm:$0xff]  }
 0x35e   :  { %2361 = vmatmul.mubr.msk.bf16.vlgmr.msra.gmra.mxu1 %vm1196_vm2, %v1294_v53  ;;  %v2581_v53 = vld [vmem:[#allocation6 + $0x8] ss:$12 sps:$4 sm:$0xff]  }
 0x35f   :  { %v1259_v46 = vpop.xlane.xlu0 %1258  ;;  %2371 = vmatpush3.bf16.msra.mxu1 %v1399_v45  ;;  %2372 = vmatprep.mubr.msk.bf16.mxu1 %vm2723_vm1, %v2722_v15 }
 0x360   :  { %2628 = vrcp.f32 %v1259_v46  ;;  %2382 = vmatprep.subr.bf16.mxu1 %v2722_v15 }
 0x361   :  { %v2625_v47 = vpop.eup %2624 }
 0x362   :  { %v1278_v49 = vmul.f32 %v2625_v47, %v2609_v0  ;;  %v1537_v0 = vsel %vm1305_vm3, %v2848_v7, 0 }
 0x363   :  { %v1265_v50 = vpop.xlane.xlu0 %1264  ;;  %v1256_v51 = vpop.xlane.xlu1 %1255 }
 0x364   :  { %2630 = vrcp.f32 %v1265_v50  ;;  %1287 = vst.msk [vmem:[%s3147_s12 + $0x1] sm:$0x1] %vm1285_vm4, %v1278_v49  ;;  %v1295_v4 = vpack.c.bf16 %v1278_v49, %v1278_v49 }
 0x365   :  { %2632 = vrcp.f32 %v1256_v51 }
 0x366   :  { %2367 = vmatmul.mubr.msk.bf16.vlgmr.msra.gmra.mxu0 %vm1196_vm2, %v1295_v4 }
 0x367   :  { %2377 = vmatpush3.bf16.msra.mxu0 %v1445_v54  ;;  %2378 = vmatprep.mubr.msk.bf16.mxu0 %vm2723_vm1, %v2722_v15 }
 0x368   :  { %2388 = vmatprep.subr.bf16.mxu0 %v2722_v15 }
 0x369   :  { %v2627_v55 = vpop.eup %2626 }
 0x36a   :  { %v1279_v57 = vmul.f32 %v2627_v55, %v2962_v20 }
 0x36b   :  { %v1262_v58 = vpop.xlane.xlu1 %1261 }
 0x36c   :  { %2634 = vrcp.f32 %v1262_v58  ;;  %1288 = vst.msk [vmem:[%s3147_s12 + $0x2] sm:$0x1] %vm1285_vm4, %v1279_v57  ;;  %v1296_v5 = vpack.c.bf16 %v1279_v57, %v1279_v57 }
 0x36d   :  { %v2629_v61 = vpop.eup %2628 }
 0x36e   :  { %2373 = vmatmul.mubr.msk.bf16.vlgmr.msra.gmra.mxu1 %vm1196_vm2, %v1296_v5  ;;  %v1281_v62 = vmul.f32 %v2629_v61, %v2966_v23  ;;  %v2556_v23 = vld [vmem:[#allocation6 + $0x94] ss:$12 sps:$4 sm:$0xff]  }
 0x36f   :  { %2383 = vmatpush3.bf16.msra.mxu1 %v1491_v60  ;;  %2384 = vmatprep.mubr.msk.bf16.mxu1 %vm2723_vm1, %v2722_v15 }
 0x370   :  { %1290 = vst.msk [vmem:[%s3147_s12 + $0x4] sm:$0x1] %vm1285_vm4, %v1281_v62  ;;  %2394 = vmatprep.subr.bf16.mxu1 %v2722_v15  ;;  %v1298_v56 = vpack.c.bf16 %v1281_v62, %v1281_v62 }
 0x371   :  { %v2631_v63 = vpop.eup %2630 }
 0x372   :  { %v2633_v1 = vpop.eup %2632  ;;  %v1283_v6 = vmul.f32 %v2631_v63, %v2972_v27  ;;  %v2560_v27 = vld [vmem:[#allocation6 + $0x7c] ss:$12 sps:$4 sm:$0xff]  }
 0x373   :  { %v1268_v2 = vpop.xlane.xlu1 %1267  ;;  %v1280_v3 = vmul.f32 %v2633_v1, %v2975_v30  ;;  %v2562_v30 = vld [vmem:[#allocation6 + $0x60] ss:$12 sps:$4 sm:$0xff]  }
 0x374   :  { %1292 = vst.msk [vmem:[%s3147_s12 + $0x6] sm:$0x1] %vm1285_vm4, %v1283_v6  ;;  %2636 = vrcp.f32 %v1268_v2  ;;  %v1300_v59 = vpack.c.bf16 %v1283_v6, %v1283_v6 }
 0x375   :  { %1289 = vst.msk [vmem:[%s3147_s12 + $0x3] sm:$0x1] %vm1285_vm4, %v1280_v3  ;;  %v1297_v10 = vpack.c.bf16 %v1280_v3, %v1280_v3 }
 0x376   :  { %2385 = vmatmul.mubr.msk.bf16.vlgmr.msra.gmra.mxu1 %vm1196_vm2, %v1298_v56 }
 0x377   :  { %2379 = vmatmul.mubr.msk.bf16.vlgmr.msra.gmra.mxu0 %vm1196_vm2, %v1297_v10  ;;  %2395 = vmatpush3.bf16.msra.mxu1 %v1583_v8 }
 0x378   :  { %2389 = vmatpush3.bf16.msra.mxu0 %v1537_v0  ;;  %2390 = vmatprep.mubr.msk.bf16.mxu0 %vm2723_vm1, %v2722_v15 }
 0x379   :  { %v2635_v11 = vpop.eup %2634  ;;  %2396 = vmatprep.mubr.msk.bf16.mxu1 %vm2723_vm1, %v2722_v15  ;;  %2400 = vmatprep.subr.bf16.mxu0 %v2722_v15 }
 0x37a   :  { %v1282_v12 = vmul.f32 %v2635_v11, %v2981_v52  ;;  %v2566_v52 = vld [vmem:[#allocation6 + $0x48] ss:$12 sps:$4 sm:$0xff]  }
 0x37c   :  { %1291 = vst.msk [vmem:[%s3147_s12 + $0x5] sm:$0x1] %vm1285_vm4, %v1282_v12  ;;  %v1299_v7 = vpack.c.bf16 %v1282_v12, %v1282_v12 }
 0x37e   :  { %2397 = vmatmul.mubr.msk.bf16.vlgmr.msra.gmra.mxu1 %vm1196_vm2, %v1300_v59 }
 0x37f   :  { %2391 = vmatmul.mubr.msk.bf16.vlgmr.msra.gmra.mxu0 %vm1196_vm2, %v1299_v7  ;;  %1910 = vmatprep.mubr.bf16.mxu1 %v2721_v48  ;;  %v2552_v48 = vld [vmem:[#allocation6 + $0xac] ss:$12 sps:$4 sm:$0xff]  }
 0x380   :  { %2401 = vmatpush3.bf16.msra.mxu0 %v1629_v14  ;;  %2402 = vmatprep.mubr.msk.bf16.mxu0 %vm2723_vm1, %v2722_v15 }
 0x381   :  { %v2637_v18 = vpop.eup %2636  ;;  %2406 = vmatprep.subr.bf16.mxu0 %v2722_v15  ;;  %1878 = vmatprep.subr.bf16.mxu1 %v2552_v48 }
 0x382   :  { %v1284_v20 = vmul.f32 %v2637_v18, %v2985_v36  ;;  %1879 = vmatpush1.bf16.msra.mxu1 %v2550_v9  ;;  %v2570_v36 = vld [vmem:[#allocation6 + $0x30] ss:$12 sps:$4 sm:$0xff]  }
 0x383   :  { %1880 = vmatprep.subr.bf16.mxu1 %v2556_v23 }
 0x384   :  { %1293 = vst.msk [vmem:[%s3147_s12 + $0x7] sm:$0x1] %vm1285_vm4, %v1284_v20  ;;  %v1301_v13 = vpack.c.bf16 %v1284_v20, %v1284_v20 }
 0x386   :  { %1881 = vmatpush1.bf16.msra.mxu1 %v2554_v24 }
 0x387   :  { %2403 = vmatmul.mubr.msk.bf16.vlgmr.msra.gmra.mxu0 %vm1196_vm2, %v1301_v13  ;;  %1882 = vmatprep.subr.bf16.mxu1 %v2560_v27 }
 0x388   :  { %2422 = vmatprep.mubr.msk.bf16.mxu0 %vm2723_vm1, %v2722_v15  ;;  %2407 = vmatpush3.bf16.msra.mxu0 %v2553_v22 }
 0x389   :  { %2408 = vmatprep.subr.bf16.mxu0 %v2722_v15 }
 0x38a   :  { %1883 = vmatpush1.bf16.msra.mxu1 %v2558_v28 }
 0x38b   :  { %1884 = vmatprep.subr.bf16.mxu1 %v2564_v31 }
 0x38c   :  { %2409 = vmatpush3.bf16.msra.mxu0 %v2557_v26 }
 0x38d   :  { %2410 = vmatprep.subr.bf16.mxu0 %v2722_v15 }
 0x38e   :  { %1885 = vmatpush1.bf16.msra.mxu1 %v2562_v30 }
 0x38f   :  { %1886 = vmatprep.subr.bf16.mxu1 %v2568_v34 }
 0x390   :  { %2411 = vmatpush3.bf16.msra.mxu0 %v2561_v29 }
 0x391   :  { %2412 = vmatprep.subr.bf16.mxu0 %v2722_v15 }
 0x392   :  { %1887 = vmatpush1.bf16.msra.mxu1 %v2566_v52 }
 0x393   :  { %1888 = vmatprep.subr.bf16.mxu1 %v2572_v37 }
 0x394   :  { %2413 = vmatpush3.bf16.msra.mxu0 %v2565_v33 }
 0x395   :  { %2414 = vmatprep.subr.bf16.mxu0 %v2722_v15 }
 0x396   :  { %1889 = vmatpush1.bf16.msra.mxu1 %v2570_v36 }
 0x397   :  { %1890 = vmatprep.subr.bf16.mxu1 %v2576_v39 }
 0x398   :  { %2415 = vmatpush3.bf16.msra.mxu0 %v2569_v35 }
 0x399   :  { %2416 = vmatprep.subr.bf16.mxu0 %v2722_v15 }
 0x39a   :  { %1891 = vmatpush1.bf16.msra.mxu1 %v2574_v40 }
 0x39b   :  { %1892 = vmatprep.subr.bf16.mxu1 %v2580_v44 }
 0x39c   :  { %2417 = vmatpush3.bf16.msra.mxu0 %v2573_v38 }
 0x39d   :  { %2418 = vmatprep.subr.bf16.mxu0 %v2722_v15 }
 0x39e   :  { %1893 = vmatpush1.bf16.msra.mxu1 %v2578_v42 }
 0x39f   :  { %2426 = vmatprep.subr.bf16.mxu1 %v2722_v15 }
 0x3a0   :  { %2419 = vmatpush3.bf16.msra.mxu0 %v2577_v41 }
 0x3a1   :  { %2420 = vmatprep.subr.bf16.mxu0 %v2722_v15 }
 0x3a4   :  { %2421 = vmatpush3.bf16.msra.mxu0 %v2581_v53 }
 0x41e   :  { %v1343_v45 = vpop.f32.mrf.mxu1 }
 0x41f   :  { %v1671_v7 = vpack.c.bf16 %v1343_v45, %v1343_v45 }
 0x420   :  { %v2362_v46 = vpop.f32.mrf.mxu1 }
 0x421   :  { %v1719_v26 = vunpack.c.l.b16 %v1671_v7 }
 0x422   :  { %v1346_v47 = vpop.f32.mrf.mxu1 }
 0x424   :  { %v2363_v49 = vpop.f32.mrf.mxu1 }
 0x426   :  { %v1389_v50 = vpop.f32.mrf.mxu0 }
 0x427   :  { %v1672_v62 = vpack.c.bf16 %v1389_v50, %v1389_v50 }
 0x428   :  { %v2368_v51 = vpop.f32.mrf.mxu0 }
 0x429   :  { %v1720_v8 = vunpack.c.l.b16 %v1672_v62  ;;  %v2589_v62 = vld [vmem:[%s3143_s8] sm:$0xff]  }
 0x42a   :  { %v1392_v4 = vpop.f32.mrf.mxu0 }
 0x42b   :  { %v1727_v20 = vrot.slane %v1720_v8, 7 }
 0x42c   :  { %v2369_v54 = vpop.f32.mrf.mxu0 }
 0x42d   :  { %v1729_v31 = vsel %vm1728_vm5, %v1727_v20, %v1719_v26  ;;  %v2582_v54 = vld [vmem:[%s3143_s8 + $0x38] sm:$0xff]  }
 0x42e   :  { %v1435_v55 = vpop.f32.mrf.mxu1 }
 0x42f   :  { %v1673_v1 = vpack.c.bf16 %v1435_v55, %v1435_v55  ;;  %v2583_v55 = vld [vmem:[%s3143_s8 + $0x30] sm:$0xff]  }
 0x430   :  { %v2374_v57 = vpop.f32.mrf.mxu1 }
 0x431   :  { %v1721_v0 = vunpack.c.l.b16 %v1673_v1  ;;  %v2584_v57 = vld [vmem:[%s3143_s8 + $0x28] sm:$0xff]  }
 0x432   :  { %v1438_v58 = vpop.f32.mrf.mxu1 }
 0x433   :  { %v1730_v9 = vrot.slane %v1721_v0, 6  ;;  %v2585_v58 = vld [vmem:[%s3143_s8 + $0x20] sm:$0xff]  }
 0x434   :  { %v2375_v5 = vpop.f32.mrf.mxu1 }
 0x435   :  { %v1732_v34 = vsel %vm1731_vm6, %v1730_v9, %v1729_v31  ;;  %v2586_v5 = vld [vmem:[%s3143_s8 + $0x18] sm:$0xff]  }
 0x436   :  { %v1527_v60 = vpop.f32.mrf.mxu1 }
 0x437   :  { %v1481_v61 = vpop.f32.mrf.mxu0  ;;  %v1675_v11 = vpack.c.bf16 %v1527_v60, %v1527_v60  ;;  %v2587_v60 = vld [vmem:[%s3143_s8 + $0x10] sm:$0xff]  }
 0x438   :  { %v2386_v63 = vpop.f32.mrf.mxu1  ;;  %v1674_v2 = vpack.c.bf16 %v1481_v61, %v1481_v61  ;;  %v2588_v61 = vld [vmem:[%s3143_s8 + $0x8] sm:$0xff]  }
 0x439   :  { %v2380_v6 = vpop.f32.mrf.mxu0  ;;  %v1723_v22 = vunpack.c.l.b16 %v1675_v11  ;;  %v161_v63 = vrot.slane %v2889_v32, %v2894_v43 }
 0x43a   :  { %v1530_v3 = vpop.f32.mrf.mxu1  ;;  %v1722_v59 = vunpack.c.l.b16 %v1674_v2  ;;  %v164_v6 = vsub.s32 1, %v2883_v25 }
 0x43b   :  { %v1484_v56 = vpop.f32.mrf.mxu0  ;;  %v1736_v52 = vrot.slane %v1723_v22, 4  ;;  %v514_v1 = vadd.f32 %v2875_v16, %v161_v63 }
 0x43c   :  { %v2387_v10 = vpop.f32.mrf.mxu1  ;;  %v1733_v27 = vrot.slane %v1722_v59, 5  ;;  %v165_v0 = vrot.slane %v2889_v32, %v164_v6 }
 0x43d   :  { %v2381_v12 = vpop.f32.mrf.mxu0 }
 0x43e   :  { %v1619_v14 = vpop.f32.mrf.mxu1  ;;  %v1735_v37 = vsel %vm1734_vm7, %v1733_v27, %v1732_v34 }
 0x43f   :  { %v1573_v18 = vpop.f32.mrf.mxu0  ;;  %v1677_v23 = vpack.c.bf16 %v1619_v14, %v1619_v14  ;;  %v1738_v41 = vsel %vm1737_vm8, %v1736_v52, %v1735_v37  ;;  %v516_v14 = vadd.f32 %v2877_v17, %v165_v0 }
 0x440   :  { %v1676_v13 = vpack.c.bf16 %v1573_v18, %v1573_v18  ;;  %v2398_v48 = vpop.f32.mrf.mxu1 }
 0x441   :  { %v2392_v24 = vpop.f32.mrf.mxu0  ;;  %v1725_v35 = vunpack.c.l.b16 %v1677_v23  ;;  %v168_v48 = vsub.s32 2, %v2883_v25 }
 0x442   :  { %v1724_v28 = vunpack.c.l.b16 %v1676_v13  ;;  %v1622_v29 = vpop.f32.mrf.mxu1  ;;  %v172_v13 = vsub.s32 3, %v2883_v25  ;;  %v88_v25 = vld [vmem:[%s3136_s1] sm:$0xff] }
 0x443   :  { %v1576_v30 = vpop.f32.mrf.mxu0  ;;  %v1742_v42 = vrot.slane %v1725_v35, 2  ;;  %v169_v23 = vrot.slane %v2889_v32, %v168_v48 }
 0x444   :  { %v2399_v33 = vpop.f32.mrf.mxu1  ;;  %v1739_v38 = vrot.slane %v1724_v28, 3  ;;  %v173_v9 = vrot.slane %v2889_v32, %v172_v13 }
 0x445   :  { %v2393_v36 = vpop.f32.mrf.mxu0  ;;  %v555_v17 = vadd.f32 %v2879_v19, %v169_v23 }
 0x446   :  { %v1741_v53 = vsel %vm1740_vm9, %v1739_v38, %v1738_v41  ;;  %v557_v24 = vadd.f32 %v2881_v21, %v173_v9  ;;  %v2215_v21 = vld [vmem:[%s3144_s9] ss:$0 sm:$0xff] }
 0x447   :  { %v1665_v39 = vpop.f32.mrf.mxu0  ;;  %v1744_v49 = vsel %vm1743_vm10, %v1742_v42, %v1741_v53 }
 0x448   :  { %v1678_v40 = vpack.c.bf16 %v1665_v39, %v1665_v39 }
 0x449   :  { %v2404_v44 = vpop.f32.mrf.mxu0 }
 0x44a   :  { %v1726_v45 = vunpack.c.l.b16 %v1678_v40 }
 0x44b   :  { %v1668_v46 = vpop.f32.mrf.mxu0 }
 0x44c   :  { %v1745_v47 = vrot.slane %v1726_v45, 1 }
 0x44d   :  { %v2405_v50 = vpop.f32.mrf.mxu0 }
 0x44e   :  { %v1747_v51 = vsel %vm1746_vm11, %v1745_v47, %v1744_v49 }
 0x44f   :  { %v1748_v4 = vpack.c.b16 %v1747_v51, %v1747_v51 }
 0x451   :  { %1911 = vmatmul.mubr.bf16.vlgmr.msra.gmra.mxu1 %v1748_v4  ;;  %2423 = vmatmul.mubr.bf16.vlgmr.msra.gmra.mxu0 %v1748_v4 }
 0x452   :  { %2442 = vmatprep.mubr.msk.bf16.mxu1 %vm2723_vm1, %v2722_v15  ;;  %2427 = vmatpush3.bf16.msra.mxu1 %v2582_v54 }
 0x453   :  { %2428 = vmatprep.subr.bf16.mxu1 %v2722_v15 }
 0x456   :  { %2429 = vmatpush3.bf16.msra.mxu1 %v2583_v55 }
 0x457   :  { %2430 = vmatprep.subr.bf16.mxu1 %v2722_v15 }
 0x45a   :  { %2431 = vmatpush3.bf16.msra.mxu1 %v2584_v57 }
 0x45b   :  { %2432 = vmatprep.subr.bf16.mxu1 %v2722_v15 }
 0x45e   :  { %2433 = vmatpush3.bf16.msra.mxu1 %v2585_v58 }
 0x45f   :  { %2434 = vmatprep.subr.bf16.mxu1 %v2722_v15 }
 0x462   :  { %2435 = vmatpush3.bf16.msra.mxu1 %v2586_v5 }
 0x463   :  { %2436 = vmatprep.subr.bf16.mxu1 %v2722_v15 }
 0x466   :  { %2437 = vmatpush3.bf16.msra.mxu1 %v2587_v60 }
 0x467   :  { %2438 = vmatprep.subr.bf16.mxu1 %v2722_v15 }
 0x46a   :  { %2439 = vmatpush3.bf16.msra.mxu1 %v2588_v61 }
 0x46b   :  { %2440 = vmatprep.subr.bf16.mxu1 %v2722_v15 }
 0x46e   :  { %2441 = vmatpush3.bf16.msra.mxu1 %v2589_v62 }
 0x511   :  { %v1912_v2 = vpop.f32.mrf.mxu1  ;;  %v1953_v3 = vpop.f32.mrf.mxu0 }
 0x512   :  { %v1959_v56 = vadd.f32 %v1912_v2, %v514_v1 }
 0x513   :  { %v1914_v8 = vpop.f32.mrf.mxu1  ;;  %v2424_v10 = vpop.f32.mrf.mxu0 }
 0x514   :  { %v2213_v11 = vmul.f32 -1.442695, %v1959_v56  ;;  %v1966_v43 = vadd.f32 %v1914_v8, %v516_v14 }
 0x515   :  { %v1916_v12 = vpop.f32.mrf.mxu1  ;;  %v1956_v7 = vpop.f32.mrf.mxu0 }
 0x516   :  { %2638 = vpow2.f32 %v2213_v11  ;;  %v2214_v18 = vmul.f32 -1.442695, %v1966_v43 }
 0x517   :  { %v1917_v15 = vpop.f32.mrf.mxu1  ;;  %v2425_v59 = vpop.f32.mrf.mxu0 }
 0x518   :  { %2640 = vpow2.f32 %v2214_v18 }
 0x523   :  { %v2639_v16 = vpop.eup %2638 }
 0x524   :  { %v1963_v20 = vadd.f32 1.0, %v2639_v16 }
 0x525   :  { %v2641_v22 = vpop.eup %2640 }
 0x526   :  { %2642 = vrcp.f32 %v1963_v20  ;;  %v1970_v26 = vadd.f32 1.0, %v2641_v22 }
 0x528   :  { %2644 = vrcp.f32 %v1970_v26 }
 0x533   :  { %v2643_v27 = vpop.eup %2642 }
 0x534   :  { %v1973_v28 = vmul.f32 %v2643_v27, %v557_v24 }
 0x535   :  { %v2645_v31 = vpop.eup %2644 }
 0x536   :  { %v1974_v29 = vadd.f32 %v1973_v28, %v555_v17  ;;  %v1977_v33 = vsub.f32 1.0, %v2645_v31  ;;  %v1979_v32 = vmul.f32 %v2645_v31, %v88_v25 }
 0x538   :  { %v1975_v30 = vadd.f32 %v1974_v29, %v1953_v3 }
 0x53a   :  { %2646 = vtanh.f32 %v1975_v30 }
 0x547   :  { %v2647_v34 = vpop.eup %2646 }
 0x548   :  { %v1978_v52 = vmul.f32 %v2647_v34, %v1977_v33 }
 0x54a   :  { %v1980_v35 = vadd.f32 %v1979_v32, %v1978_v52 }
 0x54c   :  { %1981 = vst [vmem:[%s3146_s11] sm:$0xff] %v1980_v35  ;;  %v1982_v19 = vpack.c.bf16 %v1980_v35, %v1980_v35 }
 0x54e   :  { %2443 = vmatmul.mubr.bf16.vlgmr.msra.gmra.mxu1 %v1982_v19 }
 0x60e   :  { %v2088_v36 = vpop.f32.mrf.mxu1 }
 0x60f   :  { %v2089_v37 = vadd.f32 %v2215_v21, %v2088_v36 }
 0x610   :  { %v2444_v38 = vpop.f32.mrf.mxu1 }
 0x611   :  { %2094 = vst [vmem:[%s3145_s10] sm:$0xff] %v2089_v37 }
 0x612   :  { %v2091_v39 = vpop.f32.mrf.mxu1 }
 0x614   :  { %v2445_v40 = vpop.f32.mrf.mxu1 }
 0x615   :  { %2107 = vsyncpa [#allocation3], 1 }
 0x616   :  { %2108 = vsyncpa [#allocation5], 1 }

</bundles_post_ra>
